<compile_context>
chip_gen: v7x
topology: tpu7x:2x2x1
jax: 0.10.0
libtpu: 0.0.40
codegen_flags: <defaults>
</compile_context>

<pallas_src>
import functools

import jax
import jax.numpy as jnp
from jax import lax
from jax.experimental import pallas as pl
from jax.experimental.pallas import tpu as pltpu

LANE = 128                       # lane width
EDGE_TILE = 512                  # te: edge-chunk size == edge padding granularity
NODE_TILE = 256                  # tn: node tile for the aggregations
MLP_TILE = 1024                  # tm: row tile for the MLPs
VMEM_LIMIT = 32 * 1024 * 1024    # explicit scoped-VMEM budget (fits v5e/v6e/v7x)
_NEG = -3.0e38                   # "-inf" stand-in for the running segment max
_SENTINEL = 2 ** 30              # padded-edge dst: sorts last, matches no node


def _round_up(x, m):
    return ((x + m - 1) // m) * m


# ---------------------------------------------------------------------------
# Fused MLP kernel: x @ W1 + b1 -> LeakyReLU(0.2) -> ... -> x @ Wn + bn
# bf16 matmul operands, f32 accumulation / elementwise.
# Optional fused gate (edge_msg_o): out = h[:, :out_w] * sigmoid(h[:, gate]).
# ---------------------------------------------------------------------------
def _mlp_kernel(x_ref, *refs, n_layers, gate_col, out_width):
    out_ref = refs[-1]
    h = x_ref[...]                                   # bf16 input (no double cast)
    for li in range(n_layers):
        w = refs[2 * li][...]                        # bf16 (in, out)
        b = refs[2 * li + 1][...]                    # f32  (1, out)
        h = jnp.dot(h.astype(w.dtype), w, preferred_element_type=jnp.float32) + b
        if li < n_layers - 1:
            h = jnp.maximum(h, 0.2 * h)              # LeakyReLU(0.2)
    if gate_col is not None:
        # gate logit is the LAST used column -> the feature block is an
        # aligned, zero-cost view; sigmoid goes to the EUP.
        h = h[:, :out_width] * jax.nn.sigmoid(h[:, gate_col:gate_col + 1])
    elif out_width < h.shape[1]:
        h = h[:, :out_width]
    out_ref[...] = h.astype(out_ref.dtype)


def mlp_pallas(x, packed, out_width=None, out_dtype=jnp.float32,
               gate_col=None, tm=MLP_TILE):
    """Row-tiled MLP.  `packed` = list of (W bf16 (in,out), b f32 (1,out))."""
    M, D0 = x.shape
    if out_width is None:
        out_width = packed[-1][1].shape[1]
    Mr = _round_up(M, 8)
    tm_eff = min(tm, Mr)
    # v7x megacore: keep >=2 steps on the parallel axis when there is enough
    # work to split across the two TensorCores (single TC chips just get two
    # slightly smaller tiles, which is harmless).
    if Mr <= tm and Mr >= 512:
        tm_eff = _round_up(pl.cdiv(Mr, 2), 8)
    Mp = _round_up(M, tm_eff)
    xp = x if Mp == M else jnp.pad(x, ((0, Mp - M), (0, 0)))

    in_specs = [pl.BlockSpec((tm_eff, D0), lambda i: (i, 0))]
    args = [xp]
    for (w, b) in packed:
        in_specs.append(pl.BlockSpec(w.shape, lambda i: (0, 0)))
        in_specs.append(pl.BlockSpec(b.shape, lambda i: (0, 0)))
        args += [w, b]

    out = pl.pallas_call(
        functools.partial(_mlp_kernel, n_layers=len(packed),
                          gate_col=gate_col, out_width=out_width),
        out_shape=jax.ShapeDtypeStruct((Mp, out_width), out_dtype),
        grid=(Mp // tm_eff,),
        in_specs=in_specs,
        out_specs=pl.BlockSpec((tm_eff, out_width), lambda i: (i, 0)),
        compiler_params=pltpu.CompilerParams(
            dimension_semantics=("parallel",),
            vmem_limit_bytes=VMEM_LIMIT),
    )(*args)
    return out if Mp == M else out[:M]


# ---------------------------------------------------------------------------
# Sorted-edge chunk bookkeeping: for each node tile, the [lo, hi] range of
# edge chunks that can contain its edges (hi = -1 if the tile has none).
# ---------------------------------------------------------------------------
def _tile_chunk_bounds(dst_sorted, n_tiles, tn, te):
    bounds = jnp.arange(n_tiles + 1, dtype=jnp.int32) * tn
    pos = jnp.searchsorted(dst_sorted, bounds, side="left").astype(jnp.int32)
    starts, ends = pos[:-1], pos[1:]
    has = ends > starts
    lo = jnp.where(has, starts // te, 0).astype(jnp.int32)
    hi = jnp.where(has, (ends - 1) // te, -1).astype(jnp.int32)
    return lo, hi


def _chunk_idx(j, lo_i, hi_i):
    # Clamp the streamed chunk into the tile's own [lo, hi] range: outside the
    # range the block index repeats, so Pallas elides the DMA entirely.
    return jnp.minimum(jnp.maximum(j, lo_i), jnp.maximum(hi_i, lo_i))


# ---------------------------------------------------------------------------
# Segment-sum over sorted edge destinations (DGL fn.sum): one-hot bf16 matmul
# on the MXU, accumulating directly into the VMEM-resident output block.
# Grid = (node tiles [parallel], edge chunks [arbitrary]).
# ---------------------------------------------------------------------------
def _seg_sum_kernel(lo_ref, hi_ref, dst_ref, vals_ref, out_ref, *, tn):
    i = pl.program_id(0)
    j = pl.program_id(1)

    @pl.when(j == 0)
    def _():
        out_ref[...] = jnp.zeros_like(out_ref)

    @pl.when((j >= lo_ref[i]) & (j <= hi_ref[i]))
    def _():
        node_ids = i * tn + lax.broadcasted_iota(jnp.int32, (tn, 1), 0)
        mask = (node_ids == dst_ref[...]).astype(vals_ref.dtype)       # (tn, te) bf16
        out_ref[...] += jnp.dot(mask, vals_ref[...],
                                preferred_element_type=jnp.float32)


def segment_sum_pallas(dst_sorted, vals, num_nodes, tn=NODE_TILE, te=EDGE_TILE):
    """dst_sorted: (Ep,) int32 ascending, pad = _SENTINEL; vals: (Ep, D) bf16."""
    E, D = vals.shape
    assert E % te == 0 and D % LANE == 0
    tn_eff = min(tn, _round_up(num_nodes, 8))
    Np = _round_up(num_nodes, tn_eff)
    n_tiles, n_chunks = Np // tn_eff, E // te
    lo, hi = _tile_chunk_bounds(dst_sorted, n_tiles, tn_eff, te)
    dst2 = dst_sorted.reshape(1, E)

    grid_spec = pltpu.PrefetchScalarGridSpec(
        num_scalar_prefetch=2,
        grid=(n_tiles, n_chunks),
        in_specs=[
            pl.BlockSpec((1, te),
                         lambda i, j, lo, hi: (0, _chunk_idx(j, lo[i], hi[i]))),
            pl.BlockSpec((te, D),
                         lambda i, j, lo, hi: (_chunk_idx(j, lo[i], hi[i]), 0)),
        ],
        out_specs=pl.BlockSpec((tn_eff, D), lambda i, j, lo, hi: (i, 0)),
    )
    return pl.pallas_call(
        functools.partial(_seg_sum_kernel, tn=tn_eff),
        out_shape=jax.ShapeDtypeStruct((Np, D), jnp.float32),
        grid_spec=grid_spec,
        compiler_params=pltpu.CompilerParams(
            dimension_semantics=("parallel", "arbitrary"),
            vmem_limit_bytes=VMEM_LIMIT),
    )(lo, hi, dst2, vals)


# ---------------------------------------------------------------------------
# Fused fn.sum (cols [:h1]) + fn.max (cols [h1:h1+h2]) over the gated edge
# messages.  Sum: one-hot bf16 matmul.  Max: 4 edges packed per 128-lane row,
# final cross-lane-group reduce with two pltpu.roll + max.
# ---------------------------------------------------------------------------
def _net_in_agg_kernel(lo_ref, hi_ref, dst_ref, vals_ref, vmax_ref, dstp_ref,
                       out_ref, acc_sum, acc_max, *, tn, te, h1, h2, neg):
    i = pl.program_id(0)
    j = pl.program_id(1)

    @pl.when(j == 0)
    def _():
        acc_sum[...] = jnp.zeros_like(acc_sum)
        acc_max[...] = jnp.full(acc_max.shape, neg, acc_max.dtype)

    @pl.when((j >= lo_ref[i]) & (j <= hi_ref[i]))
    def _():
        node_ids = i * tn + lax.broadcasted_iota(jnp.int32, (tn, 1), 0)

        # --- fn.sum on the MXU: one-hot(dst) @ vals (bf16 operands, f32 acc)
        mask = (node_ids == dst_ref[...]).astype(vals_ref.dtype)       # (tn, te)
        acc_sum[...] += jnp.dot(mask, vals_ref[...],
                                preferred_element_type=jnp.float32)

        # --- fn.max: 4 edges (h2 = 32 lanes each) packed per 128-lane row
        def body(r, acc):
            dvec = dstp_ref[pl.ds(r, 1), :]                            # (1, 128) int32
            v = vmax_ref[pl.ds(r, 1), :].astype(jnp.float32)           # (1, 128)
            return jnp.maximum(acc, jnp.where(node_ids == dvec, v, neg))

        acc_max[...] = lax.fori_loop(0, te // 4, body, acc_max[...], unroll=4)

    @pl.when(j == pl.num_programs(1) - 1)
    def _():
        # reduce the 4 lane groups of the running max (2 XLU rolls + max)
        a = acc_max[...]
        a = jnp.maximum(a, pltpu.roll(a, shift=2 * h2, axis=1))
        a = jnp.maximum(a, pltpu.roll(a, shift=h2, axis=1))
        mx = a[:, :h2]
        out_ref[:, :h1] = acc_sum[:, :h1]
        out_ref[:, h1:h1 + h2] = jnp.where(mx > neg * 0.5, mx, 0.0)    # zero-fill


def net_in_aggregate(dst_sorted, gated, num_nodes, h1, h2,
                     tn=NODE_TILE, te=EDGE_TILE):
    """gated: (Ep, h1+h2) bf16 = [f1*k | f2*k], edge rows sorted by dst."""
    E, W = gated.shape
    assert W == h1 + h2 and E % te == 0
    assert 4 * h2 == LANE, "4-edge max packing assumes h2 == 32"
    tn_eff = min(tn, _round_up(num_nodes, 8))
    Np = _round_up(num_nodes, tn_eff)
    n_tiles, n_chunks = Np // tn_eff, E // te
    lo, hi = _tile_chunk_bounds(dst_sorted, n_tiles, tn_eff, te)

    dst2 = dst_sorted.reshape(1, E)
    # 4 edges per 128-lane row: row r lane l = edge 4r + l//32, feature l%32.
    vmax = gated[:, h1:h1 + h2].reshape(E // 4, LANE)
    dstp = jnp.repeat(dst_sorted, h2).reshape(E // 4, LANE)            # per-lane dst

    def idx_row(i, j, lo, hi):
        return (_chunk_idx(j, lo[i], hi[i]), 0)

    def idx_col(i, j, lo, hi):
        return (0, _chunk_idx(j, lo[i], hi[i]))

    grid_spec = pltpu.PrefetchScalarGridSpec(
        num_scalar_prefetch=2,
        grid=(n_tiles, n_chunks),
        in_specs=[
            pl.BlockSpec((1, te), idx_col),            # dst row (VMEM, sum mask)
            pl.BlockSpec((te, W), idx_row),            # gated chunk (bf16)
            pl.BlockSpec((te // 4, LANE), idx_row),    # packed max cols (bf16)
            pl.BlockSpec((te // 4, LANE), idx_row),    # packed dst lanes (int32)
        ],
        out_specs=pl.BlockSpec((tn_eff, W), lambda i, j, lo, hi: (i, 0)),
        scratch_shapes=[pltpu.VMEM((tn_eff, W), jnp.float32),
                        pltpu.VMEM((tn_eff, LANE), jnp.float32)],
    )
    return pl.pallas_call(
        functools.partial(_net_in_agg_kernel, tn=tn_eff, te=te,
                          h1=h1, h2=h2, neg=_NEG),
        out_shape=jax.ShapeDtypeStruct((Np, W), jnp.float32),
        grid_spec=grid_spec,
        compiler_params=pltpu.CompilerParams(
            dimension_semantics=("parallel", "arbitrary"),
            vmem_limit_bytes=VMEM_LIMIT),
    )(lo, hi, dst2, gated, vmax, dstp)


# ---------------------------------------------------------------------------
# Parameters (PyTorch nn.Linear-style init; weights stored (in, out)).
# ---------------------------------------------------------------------------
def init_mlp(key, sizes):
    params = []
    for i in range(1, len(sizes)):
        key, kw, kb = jax.random.split(key, 3)
        bound = 1.0 / (sizes[i - 1] ** 0.5)
        w = jax.random.uniform(kw, (sizes[i - 1], sizes[i]), jnp.float32, -bound, bound)
        b = jax.random.uniform(kb, (sizes[i],), jnp.float32, -bound, bound)
        params.append((w, b))
    return params


def pack_mlp(params, gated=False, mm_dtype=jnp.bfloat16):
    packed = []
    n = len(params)
    for li, (w, b) in enumerate(params):
        if li == n - 1:
            if gated:
                # original column 0 is the gate logit -> move it last so the
                # gated feature block [f1 | f2] starts at lane 0.
                w = jnp.concatenate([w[:, 1:], w[:, :1]], axis=1)
                b = jnp.concatenate([b[1:], b[:1]], axis=0)
            out = w.shape[1]
            out_p = _round_up(out, LANE)
            w = jnp.pad(w, ((0, 0), (0, out_p - out)))
            b = jnp.pad(b, (0, out_p - out))
        packed.append((w.astype(mm_dtype), b.reshape(1, -1).astype(jnp.float32)))
    return packed


def init_netconv(key, in_nf, in_ef, out_nf, h1=32, h2=32):
    k1, k2, k3 = jax.random.split(key, 3)
    raw = {
        "msg_i2o": init_mlp(k1, [in_nf * 2 + in_ef, 64, 64, 64, 1 + h1 + h2]),
        "reduce_o": init_mlp(k2, [in_nf + h1 + h2, 64, 64, 64, out_nf]),
        "msg_o2i": init_mlp(k3, [in_nf * 2 + in_ef, 64, 64, 64, 64, out_nf]),
    }
    packed = {
        "msg_i2o": pack_mlp(raw["msg_i2o"], gated=True),
        "reduce_o": pack_mlp(raw["reduce_o"]),
        "msg_o2i": pack_mlp(raw["msg_o2i"]),
        "h1": h1, "h2": h2, "out_nf": out_nf,
    }
    return raw, packed


# ---------------------------------------------------------------------------
# NetConv forward
# ---------------------------------------------------------------------------
def _prep_edges(src, dst, ef, pad_to):
    """Sort edges by dst (reused by every aggregation) and pad once."""
    E = src.shape[0]
    src = src.astype(jnp.int32)
    dst = dst.astype(jnp.int32)
    order = jnp.argsort(dst)
    src, dst, ef = src[order], dst[order], ef[order]
    Ep = _round_up(max(E, 1), pad_to)
    pad = Ep - E
    src_g = jnp.pad(src, (0, pad))                                   # gather-safe
    dst_g = jnp.pad(dst, (0, pad))                                   # gather-safe
    dst_s = jnp.pad(dst, (0, pad), constant_values=_SENTINEL)        # sorts last, no match
    ef_p = jnp.pad(ef, ((0, pad), (0, 0)))
    return src_g, dst_g, dst_s, ef_p


def netconv_forward(params, nf,
                    src_out, dst_out, ef_out,     # 'net_out' edges
                    src_in, dst_in, ef_in,        # 'net_in' edges
                    output_nodes):
    N = nf.shape[0]
    h1, h2 = params["h1"], params["h2"]
    out_nf = params["out_nf"]
    nf_b = nf.astype(jnp.bfloat16)

    # --- update_all(edge_msg_i, fn.sum('efi','new_nf')) on etype 'net_out' --
    so, dog, dos, efo = _prep_edges(src_out, dst_out, ef_out, EDGE_TILE)
    # TODO(synk): fuse this gather+concat into the edge-MLP kernel (manual DMA
    #             row gather from a pl.ANY nf ref) to kill the x_o round trip.
    x_o = jnp.concatenate([nf_b[so], nf_b[dog], efo.astype(jnp.bfloat16)], axis=1)
    efi = mlp_pallas(x_o, params["msg_o2i"], out_dtype=jnp.bfloat16)   # (Eo_p, 128)
    new_nf = segment_sum_pallas(dos, efi, N)                           # (Np, 128) f32

    # --- apply_edges(edge_msg_o) on 'net_in' (fused sigmoid gate) -----------
    si, dig, dis, efe = _prep_edges(src_in, dst_in, ef_in, EDGE_TILE)
    x_i = jnp.concatenate([nf_b[si], nf_b[dig], efe.astype(jnp.bfloat16)], axis=1)
    gated = mlp_pallas(x_i, params["msg_i2o"], out_width=h1 + h2,
                       out_dtype=jnp.bfloat16, gate_col=h1 + h2)       # (Ei_p, 64) bf16

    # --- fn.sum('efo1','nfo1') and fn.max('efo2','nfo2') in ONE fused pass --
    agg = net_in_aggregate(dis, gated, N, h1, h2)                      # (Np, 64) f32

    # --- apply_nodes(node_reduce_o, output_nodes) ---------------------------
    onodes = output_nodes.astype(jnp.int32)
    x_r = jnp.concatenate([nf_b[onodes], agg[onodes].astype(jnp.bfloat16)], axis=1)
    out_r = mlp_pallas(x_r, params["reduce_o"], out_dtype=jnp.float32)  # (K, 128)

    new_nf = new_nf.at[onodes].set(out_r)
    return new_nf[:N, :out_nf]


# ---------------------------------------------------------------------------
# Pure-JAX f32 reference (mirrors the PyTorch module) for a sanity check.
# ---------------------------------------------------------------------------
def _mlp_ref(x, params):
    h = x
    for li, (w, b) in enumerate(params):
        h = h @ w + b
        if li < len(params) - 1:
            h = jnp.where(h > 0, h, 0.2 * h)
    return h


def netconv_reference(raw, h1, h2, nf, src_out, dst_out, ef_out,
                      src_in, dst_in, ef_in, output_nodes):
    N = nf.shape[0]
    x_o = jnp.concatenate([nf[src_out], nf[dst_out], ef_out], axis=1)
    efi = _mlp_ref(x_o, raw["msg_o2i"])
    new_nf = jax.ops.segment_sum(efi, dst_out, num_segments=N)

    x_i = jnp.concatenate([nf[src_in], nf[dst_in], ef_in], axis=1)
    y = _mlp_ref(x_i, raw["msg_i2o"])
    k = jax.nn.sigmoid(y[:, :1])
    efo1, efo2 = y[:, 1:1 + h1] * k, y[:, 1 + h1:] * k
    nfo1 = jax.ops.segment_sum(efo1, dst_in, num_segments=N)
    mx = jax.ops.segment_max(efo2, dst_in, num_segments=N)
    cnt = jax.ops.segment_sum(jnp.ones((dst_in.shape[0], 1)), dst_in, num_segments=N)
    nfo2 = jnp.where(cnt > 0, mx, 0.0)

    x_r = jnp.concatenate([nf, nfo1, nfo2], axis=1)[output_nodes]
    out_r = _mlp_ref(x_r, raw["reduce_o"])
    return new_nf.at[output_nodes].set(out_r)


# ---------------------------------------------------------------------------
if __name__ == "__main__":
    key = jax.random.PRNGKey(0)
    N, in_nf, in_ef, out_nf = 16, 8, 4, 8
    Eo, Ei = 24, 24

    ks = jax.random.split(key, 8)
    nf = jax.random.normal(ks[0], (N, in_nf), jnp.float32)
    src_out = jax.random.randint(ks[1], (Eo,), 0, N)
    dst_out = jax.random.randint(ks[2], (Eo,), 0, N)
    ef_out = jax.random.normal(ks[3], (Eo, in_ef), jnp.float32)
    src_in = jax.random.randint(ks[4], (Ei,), 0, N)
    dst_in = jax.random.randint(ks[5], (Ei,), 0, N)
    ef_in = jax.random.normal(ks[6], (Ei, in_ef), jnp.float32)
    output_nodes = jnp.arange(0, N, 2, dtype=jnp.int32)

    raw, packed = init_netconv(ks[7], in_nf, in_ef, out_nf, h1=32, h2=32)

    new_nf = netconv_forward(packed, nf,
                             src_out, dst_out, ef_out,
                             src_in, dst_in, ef_in,
                             output_nodes)
    jax.block_until_ready(new_nf)

    assert new_nf.shape == (N, out_nf)
    assert bool(jnp.all(jnp.isfinite(new_nf)))

    ref = netconv_reference(raw, 32, 32, nf, src_out, dst_out, ef_out,
                            src_in, dst_in, ef_in, output_nodes)
    rel = float(jnp.linalg.norm(new_nf - ref) / (jnp.linalg.norm(ref) + 1e-6))
    assert rel < 0.1, f"kernel vs reference relative error too large: {rel}"

    print("KERNEL_OK")
</pallas_src>

<mosaic_0001>
module attributes {stable_mosaic.version = 11 : i64} {
  func.func @_mlp_kernel(%arg0: i32, %arg1: memref<256x20xbf16, #tpu.memory_space<vmem>>, %arg2: memref<20x64xbf16, #tpu.memory_space<vmem>>, %arg3: memref<1x64xf32, #tpu.memory_space<vmem>>, %arg4: memref<64x64xbf16, #tpu.memory_space<vmem>>, %arg5: memref<1x64xf32, #tpu.memory_space<vmem>>, %arg6: memref<64x64xbf16, #tpu.memory_space<vmem>>, %arg7: memref<1x64xf32, #tpu.memory_space<vmem>>, %arg8: memref<64x64xbf16, #tpu.memory_space<vmem>>, %arg9: memref<1x64xf32, #tpu.memory_space<vmem>>, %arg10: memref<64x128xbf16, #tpu.memory_space<vmem>>, %arg11: memref<1x128xf32, #tpu.memory_space<vmem>>, %arg12: memref<256x128xbf16, #tpu.memory_space<vmem>>) attributes {dimension_semantics = [#tpu.dimension_semantics<parallel>], iteration_bounds = array<i64: 2>, scalar_prefetch = 0 : i64, scratch_operands = 0 : i64, tpu.core_type = #tpu.core_type<tc>, window_params = [{transform_indices = @transform_0, window_bounds = array<i64: 256, 20>}, {pipeline_mode = #tpu.pipeline_mode<synchronous>, transform_indices = @transform_1, window_bounds = array<i64: 20, 64>}, {pipeline_mode = #tpu.pipeline_mode<synchronous>, transform_indices = @transform_2, window_bounds = array<i64: 1, 64>}, {pipeline_mode = #tpu.pipeline_mode<synchronous>, transform_indices = @transform_3, window_bounds = array<i64: 64, 64>}, {pipeline_mode = #tpu.pipeline_mode<synchronous>, transform_indices = @transform_4, window_bounds = array<i64: 1, 64>}, {pipeline_mode = #tpu.pipeline_mode<synchronous>, transform_indices = @transform_5, window_bounds = array<i64: 64, 64>}, {pipeline_mode = #tpu.pipeline_mode<synchronous>, transform_indices = @transform_6, window_bounds = array<i64: 1, 64>}, {pipeline_mode = #tpu.pipeline_mode<synchronous>, transform_indices = @transform_7, window_bounds = array<i64: 64, 64>}, {pipeline_mode = #tpu.pipeline_mode<synchronous>, transform_indices = @transform_8, window_bounds = array<i64: 1, 64>}, {pipeline_mode = #tpu.pipeline_mode<synchronous>, transform_indices = @transform_9, window_bounds = array<i64: 64, 128>}, {pipeline_mode = #tpu.pipeline_mode<synchronous>, transform_indices = @transform_10, window_bounds = array<i64: 1, 128>}, {transform_indices = @transform_11, window_bounds = array<i64: 256, 128>}]} {
    %c0 = arith.constant 0 : index
    %c0_0 = arith.constant 0 : index
    %0 = vector.load %arg1[%c0, %c0_0] : memref<256x20xbf16, #tpu.memory_space<vmem>>, vector<256x20xbf16>
    %c0_1 = arith.constant 0 : index
    %c0_2 = arith.constant 0 : index
    %1 = vector.load %arg2[%c0_1, %c0_2] : memref<20x64xbf16, #tpu.memory_space<vmem>>, vector<20x64xbf16>
    %c0_3 = arith.constant 0 : index
    %c0_4 = arith.constant 0 : index
    %2 = vector.load %arg3[%c0_3, %c0_4] : memref<1x64xf32, #tpu.memory_space<vmem>>, vector<1x64xf32>
    %cst = arith.constant dense<0.000000e+00> : vector<256x64xf32>
    %3 = tpu.matmul %0, %1, %cst {dimension_numbers = #tpu.dot_dimension_numbers<[1], [0], [0], [1], [0, 0, 1, 1], [], []>} : vector<256x20xbf16>, vector<20x64xbf16>, vector<256x64xf32> -> vector<256x64xf32>
    %4 = vector.broadcast %2 : vector<1x64xf32> to vector<256x64xf32>
    %5 = arith.addf %3, %4 : vector<256x64xf32>
    %cst_5 = arith.constant 2.000000e-01 : f32
    %6 = vector.broadcast %cst_5 : f32 to vector<256x64xf32>
    %7 = arith.mulf %6, %5 : vector<256x64xf32>
    %8 = arith.maximumf %5, %7 : vector<256x64xf32>
    %c0_6 = arith.constant 0 : index
    %c0_7 = arith.constant 0 : index
    %9 = vector.load %arg4[%c0_6, %c0_7] : memref<64x64xbf16, #tpu.memory_space<vmem>>, vector<64x64xbf16>
    %c0_8 = arith.constant 0 : index
    %c0_9 = arith.constant 0 : index
    %10 = vector.load %arg5[%c0_8, %c0_9] : memref<1x64xf32, #tpu.memory_space<vmem>>, vector<1x64xf32>
    %11 = arith.truncf %8 : vector<256x64xf32> to vector<256x64xbf16>
    %cst_10 = arith.constant dense<0.000000e+00> : vector<256x64xf32>
    %12 = tpu.matmul %11, %9, %cst_10 {dimension_numbers = #tpu.dot_dimension_numbers<[1], [0], [0], [1], [0, 0, 1, 1], [], []>} : vector<256x64xbf16>, vector<64x64xbf16>, vector<256x64xf32> -> vector<256x64xf32>
    %13 = vector.broadcast %10 : vector<1x64xf32> to vector<256x64xf32>
    %14 = arith.addf %12, %13 : vector<256x64xf32>
    %cst_11 = arith.constant 2.000000e-01 : f32
    %15 = vector.broadcast %cst_11 : f32 to vector<256x64xf32>
    %16 = arith.mulf %15, %14 : vector<256x64xf32>
    %17 = arith.maximumf %14, %16 : vector<256x64xf32>
    %c0_12 = arith.constant 0 : index
    %c0_13 = arith.constant 0 : index
    %18 = vector.load %arg6[%c0_12, %c0_13] : memref<64x64xbf16, #tpu.memory_space<vmem>>, vector<64x64xbf16>
    %c0_14 = arith.constant 0 : index
    %c0_15 = arith.constant 0 : index
    %19 = vector.load %arg7[%c0_14, %c0_15] : memref<1x64xf32, #tpu.memory_space<vmem>>, vector<1x64xf32>
    %20 = arith.truncf %17 : vector<256x64xf32> to vector<256x64xbf16>
    %cst_16 = arith.constant dense<0.000000e+00> : vector<256x64xf32>
    %21 = tpu.matmul %20, %18, %cst_16 {dimension_numbers = #tpu.dot_dimension_numbers<[1], [0], [0], [1], [0, 0, 1, 1], [], []>} : vector<256x64xbf16>, vector<64x64xbf16>, vector<256x64xf32> -> vector<256x64xf32>
    %22 = vector.broadcast %19 : vector<1x64xf32> to vector<256x64xf32>
    %23 = arith.addf %21, %22 : vector<256x64xf32>
    %cst_17 = arith.constant 2.000000e-01 : f32
    %24 = vector.broadcast %cst_17 : f32 to vector<256x64xf32>
    %25 = arith.mulf %24, %23 : vector<256x64xf32>
    %26 = arith.maximumf %23, %25 : vector<256x64xf32>
    %c0_18 = arith.constant 0 : index
    %c0_19 = arith.constant 0 : index
    %27 = vector.load %arg8[%c0_18, %c0_19] : memref<64x64xbf16, #tpu.memory_space<vmem>>, vector<64x64xbf16>
    %c0_20 = arith.constant 0 : index
    %c0_21 = arith.constant 0 : index
    %28 = vector.load %arg9[%c0_20, %c0_21] : memref<1x64xf32, #tpu.memory_space<vmem>>, vector<1x64xf32>
    %29 = arith.truncf %26 : vector<256x64xf32> to vector<256x64xbf16>
    %cst_22 = arith.constant dense<0.000000e+00> : vector<256x64xf32>
    %30 = tpu.matmul %29, %27, %cst_22 {dimension_numbers = #tpu.dot_dimension_numbers<[1], [0], [0], [1], [0, 0, 1, 1], [], []>} : vector<256x64xbf16>, vector<64x64xbf16>, vector<256x64xf32> -> vector<256x64xf32>
    %31 = vector.broadcast %28 : vector<1x64xf32> to vector<256x64xf32>
    %32 = arith.addf %30, %31 : vector<256x64xf32>
    %cst_23 = arith.constant 2.000000e-01 : f32
    %33 = vector.broadcast %cst_23 : f32 to vector<256x64xf32>
    %34 = arith.mulf %33, %32 : vector<256x64xf32>
    %35 = arith.maximumf %32, %34 : vector<256x64xf32>
    %c0_24 = arith.constant 0 : index
    %c0_25 = arith.constant 0 : index
    %36 = vector.load %arg10[%c0_24, %c0_25] : memref<64x128xbf16, #tpu.memory_space<vmem>>, vector<64x128xbf16>
    %c0_26 = arith.constant 0 : index
    %c0_27 = arith.constant 0 : index
    %37 = vector.load %arg11[%c0_26, %c0_27] : memref<1x128xf32, #tpu.memory_space<vmem>>, vector<1x128xf32>
    %38 = arith.truncf %35 : vector<256x64xf32> to vector<256x64xbf16>
    %cst_28 = arith.constant dense<0.000000e+00> : vector<256x128xf32>
    %39 = tpu.matmul %38, %36, %cst_28 {dimension_numbers = #tpu.dot_dimension_numbers<[1], [0], [0], [1], [0, 0, 1, 1], [], []>} : vector<256x64xbf16>, vector<64x128xbf16>, vector<256x128xf32> -> vector<256x128xf32>
    %40 = vector.broadcast %37 : vector<1x128xf32> to vector<256x128xf32>
    %41 = arith.addf %39, %40 : vector<256x128xf32>
    %42 = arith.truncf %41 : vector<256x128xf32> to vector<256x128xbf16>
    %c0_29 = arith.constant 0 : index
    %c0_30 = arith.constant 0 : index
    %43 = vector.load %arg12[%c0_29, %c0_30] : memref<256x128xbf16, #tpu.memory_space<vmem>>, vector<256x128xbf16>
    tpu.vector_store %arg12[%c0_29, %c0_30], %42 {strides = array<i32>} : memref<256x128xbf16, #tpu.memory_space<vmem>>, vector<256x128xbf16>,
    return
  }
  func.func @transform_0(%arg0: i32) -> (i32, i32) {
    %c0_i32 = arith.constant 0 : i32
    %c0_i32_0 = arith.constant 0 : i32
    return %arg0, %c0_i32 : i32, i32
  }
  func.func @transform_1(%arg0: i32) -> (i32, i32) {
    %c0_i32 = arith.constant 0 : i32
    %c0_i32_0 = arith.constant 0 : i32
    %c0_i32_1 = arith.constant 0 : i32
    return %c0_i32, %c0_i32_0 : i32, i32
  }
  func.func @transform_2(%arg0: i32) -> (i32, i32) {
    %c0_i32 = arith.constant 0 : i32
    %c0_i32_0 = arith.constant 0 : i32
    %c0_i32_1 = arith.constant 0 : i32
    return %c0_i32, %c0_i32_0 : i32, i32
  }
  func.func @transform_3(%arg0: i32) -> (i32, i32) {
    %c0_i32 = arith.constant 0 : i32
    %c0_i32_0 = arith.constant 0 : i32
    %c0_i32_1 = arith.constant 0 : i32
    return %c0_i32, %c0_i32_0 : i32, i32
  }
  func.func @transform_4(%arg0: i32) -> (i32, i32) {
    %c0_i32 = arith.constant 0 : i32
    %c0_i32_0 = arith.constant 0 : i32
    %c0_i32_1 = arith.constant 0 : i32
    return %c0_i32, %c0_i32_0 : i32, i32
  }
  func.func @transform_5(%arg0: i32) -> (i32, i32) {
    %c0_i32 = arith.constant 0 : i32
    %c0_i32_0 = arith.constant 0 : i32
    %c0_i32_1 = arith.constant 0 : i32
    return %c0_i32, %c0_i32_0 : i32, i32
  }
  func.func @transform_6(%arg0: i32) -> (i32, i32) {
    %c0_i32 = arith.constant 0 : i32
    %c0_i32_0 = arith.constant 0 : i32
    %c0_i32_1 = arith.constant 0 : i32
    return %c0_i32, %c0_i32_0 : i32, i32
  }
  func.func @transform_7(%arg0: i32) -> (i32, i32) {
    %c0_i32 = arith.constant 0 : i32
    %c0_i32_0 = arith.constant 0 : i32
    %c0_i32_1 = arith.constant 0 : i32
    return %c0_i32, %c0_i32_0 : i32, i32
  }
  func.func @transform_8(%arg0: i32) -> (i32, i32) {
    %c0_i32 = arith.constant 0 : i32
    %c0_i32_0 = arith.constant 0 : i32
    %c0_i32_1 = arith.constant 0 : i32
    return %c0_i32, %c0_i32_0 : i32, i32
  }
  func.func @transform_9(%arg0: i32) -> (i32, i32) {
    %c0_i32 = arith.constant 0 : i32
    %c0_i32_0 = arith.constant 0 : i32
    %c0_i32_1 = arith.constant 0 : i32
    return %c0_i32, %c0_i32_0 : i32, i32
  }
  func.func @transform_10(%arg0: i32) -> (i32, i32) {
    %c0_i32 = arith.constant 0 : i32
    %c0_i32_0 = arith.constant 0 : i32
    %c0_i32_1 = arith.constant 0 : i32
    return %c0_i32, %c0_i32_0 : i32, i32
  }
  func.func @transform_11(%arg0: i32) -> (i32, i32) {
    %c0_i32 = arith.constant 0 : i32
    %c0_i32_0 = arith.constant 0 : i32
    return %arg0, %c0_i32 : i32, i32
  }
}

</mosaic_0001>

<bundles_post_ra>
// kernel: tpu_custom_call.1
= control target key start
LH: loop header
LB: loop body
LE: loop exit
PB: predicated region body
PF: predicated region fallthrough
CT: control target
= control target key end

     0   :  { %16 = vsyncpa [#allocation3], 0  ;;  %s3544_s0 = inlined_call_operand.vmem [shape: bf16[512,20], index: 0, kind: input, shape index: {}]   ;;  %s3545_s1 = inlined_call_operand.vmem [shape: bf16[20,64], index: 1, kind: input, shape index: {}]   ;;  %s3546_s2 = inlined_call_operand.vmem [shape: f32[1,64], index: 2, kind: input, shape index: {}]   ;;  %s3547_s3 = inlined_call_operand.vmem [shape: bf16[64,64], index: 3, kind: input, shape index: {}]   ;;  %s3548_s4 = inlined_call_operand.vmem [shape: f32[1,64], index: 4, kind: input, shape index: {}]   ;;  %s3549_s5 = inlined_call_operand.vmem [shape: bf16[64,64], index: 5, kind: input, shape index: {}]   ;;  %s3550_s6 = inlined_call_operand.vmem [shape: f32[1,64], index: 6, kind: input, shape index: {}]   ;;  %s3551_s7 = inlined_call_operand.vmem [shape: bf16[64,64], index: 7, kind: input, shape index: {}]   ;;  %s3552_s8 = inlined_call_operand.vmem [shape: f32[1,64], index: 8, kind: input, shape index: {}]   ;;  %s3553_s9 = inlined_call_operand.vmem [shape: bf16[64,128], index: 9, kind: input, shape index: {}]   ;;  %s3554_s10 = inlined_call_operand.vmem [shape: f32[1,128], index: 10, kind: input, shape index: {}]   ;;  %s3555_s11 = inlined_call_operand.hbm [shape: bf16[512,128], index: 11, kind: output, shape index: {}]  }
   0x1   :  { %18 = vsyncpa [#allocation3 + $0x1], 0  ;;  %s3076_s17 = smov 0   ;;  %s3078_s18 = smov 0  }
   0x2   :  { %s3080_s19 = smov 0   ;;  %s3082_s20 = smov 0  }
   0x3 LB: > { %s3097_s21 = sadd.s32 4294967295, %s3011_s20   ;;  %s2283_s22 = sadd.s32 4294967294, %s3011_s20   ;;  %s3011_s20 = sphi %s3082_s20, %s3561_s20   ;;  %s3007_s19 = sphi %s3080_s19, %s3560_s19   ;;  %s3003_s18 = sphi %s3078_s18, %s3559_s18   ;;  %s2999_s17 = sphi %s3076_s17, %s3558_s17  }
   0x4   : > { %s3101_s23 = sadd.s32 1, %s3011_s20   ;;  %s267_s24 = sadd.s32 1, %s3007_s19 }
   0x5   : > { %s264_s25 = ssub.s32 %s3011_s20, %s3101_s23  ;;  %p277_p0 = scmp.ne.s32.totalorder %s3007_s19, %s3003_s18 }
   0x6   : > { %p265_p1 = scmp.eq.s32.totalorder %s264_s25, 0  ;;  %p278_p2 = scmp.eq.s32.totalorder %s3097_s21, 1 }
   0x7   : > { %p283_p3 = scmp.ne.s32.totalorder %s3003_s18, %s2999_s17  ;;  %p284_p4 = scmp.eq.s32.totalorder %s2283_s22, 1 }
   0x8   : > { %s3112_s26 = scalar_select %p265_p1, %s3007_s19, %s267_s24  }
   0x9   : > { %p3114_p5 = por %p278_p2, %p277_p0  ;;  %p3118_p6 = por %p284_p4, %p283_p3 }
   0xa   : > { %p2286_p7 = scmp.ge.s32.totalorder %s3011_s20, 1  ;;  %p341_p8 = scmp.lt.s32.totalorder %s3011_s20, 3 }
   0xc   : > { %p342_p9 = pnand %p2286_p7, %p341_p8 }
   0xd   : > { %v2915_v0 = vld [vmem:[%s3545_s1] sm:$0xff] (!%p342_p9)   ;;  %vm569_vm0 = vcmask (!%p342_p9), 1041408   ;;  %v2916_v1 = vld [vmem:[%s3545_s1 + $0x8] ss:$0 sps:$4 sm:$0x33] (!%p342_p9)   ;;  %s2288_s14 = sshll.u32 (!%p342_p9), %s3097_s21, 5 }
   0xe   : > { %345 = sbr.rel (%p342_p9) target bundleno = 1212 (0x4bc), region = 64  ;;  %2672 = vmatprep.subr.bf16.mxu0 (!%p342_p9), %v2915_v0  ;;  %p382_p10 = scmp.lt.s32.totalorder (!%p342_p9), %s2288_s14, 63  ;;  %2868 = vmatprep.subr.bf16.mxu1 (!%p342_p9), %v2915_v0  ;;  %v571_v2 = vsel (!%p342_p9), %vm569_vm0, %v2916_v1, 0  ;;  %v2933_v3 = vld [vmem:[%s3547_s3] sm:$0xff] (!%p342_p9)   ;;  %vm520_vm1 = vcmask (!%p342_p9), 162816   ;;  %v2934_v10 = vld [vmem:[%s3547_s3 + $0x8] sm:$0xff] (!%p342_p9)  }
   0xf   : > { %2673 = vmatpush3.bf16.msra.mxu0 (!%p342_p9), %v2915_v0  ;;  %2870 = vmatpush3.bf16.msra.mxu1 (!%p342_p9), %v2915_v0  ;;  %v2935_v13 = vld [vmem:[%s3547_s3 + $0x10] sm:$0xff] (!%p342_p9)   ;;  %v2936_v22 = vld [vmem:[%s3547_s3 + $0x18] sm:$0xff] (!%p342_p9)   ;;  %v2937_v23 = vld [vmem:[%s3549_s5] sm:$0xff] (!%p342_p9)   ;;  %vm853_vm2 = vcmask (!%p342_p9), 523264   ;;  %s378_s25 = sand.u32 (!%p342_p9), 1, %s3003_s18  }
  0x10   : > { %2872 = vmatprep.subr.msk.bf16.mxu0 (!%p342_p9), %vm569_vm0, %v2916_v1  ;;  %2873 = vmatprep.subr.msk.bf16.mxu1 (!%p342_p9), %vm569_vm0, %v2916_v1  ;;  %v2938_v24 = vld [vmem:[%s3549_s5 + $0x8] sm:$0xff] (!%p342_p9)   ;;  %v2939_v25 = vld [vmem:[%s3549_s5 + $0x10] sm:$0xff] (!%p342_p9)   ;;  %v3192_v26 = vld [vmem:[%s3546_s2] ss:$0 sm:$0xff] (!%p342_p9)  ;;  %s2287_s12 = sshll.u32 (!%p342_p9), %s378_s25, 7 }
  0x11   : > { %s3446_s13 = scalar_lea.vmem (!%p342_p9), [#allocation2], %s2287_s12 }
  0x12   : > { %s2221_s15 = sshll.u32 (!%p342_p9), %s3446_s13, 4  ;;  %s3497_s15 = int_to_ptr.vmem [resolvable:$true] %s2221_s15 }
  0x13   : > { %2675 = vmatpush3.bf16.msra.mxu0 (!%p342_p9), %v571_v2  ;;  %2871 = vmatpush3.bf16.msra.mxu1 (!%p342_p9), %v571_v2  ;;  %s2949_s30 = scalar_lea.vmem (!%p342_p9), %s3497_s15, 2048 }
  0x14   : > { %2708 = vmatprep.subr.bf16.mxu1 (!%p342_p9), %v2933_v3  ;;  %2748 = vmatprep.subr.bf16.mxu0 (!%p342_p9), %v2937_v23  ;;  %p2950_p11 = scmp.ne.s32.totalorder (!%p342_p9), %s3497_s15, %s2949_s30 }
  0x15   : > { %s3563_s14 = smov (!%p382_p10, %s2288_s14), 63 }
  0x16   : > { %s2289_s22 = sshll.u32 %s3563_s14, 2  ;;  %s2478_s14 = sshll.u32 %s3097_s21, 11 }
  0x17   : > { %s3137_s29 = scalar_lea.vmem %s3544_s0, %s2289_s22  ;;  %s3495_s24 = scalar_lea.hbm %s3555_s11, %s2478_s14 }
  0x18   : > { %v2917_v4 = vld [vmem:[%s3137_s29] sm:$0xff]   ;;  %v2918_v5 = vld [vmem:[%s3137_s29 + $0x8] sm:$0xff]   ;;  %v2919_v6 = vld [vmem:[%s3137_s29 + $0x10] sm:$0xff]   ;;  %s3503_s21 = scalar_lea.sflag [#allocation3], %s378_s25  ;;  %p2951_p12 = pnand %p2950_p11, %p3114_p5 }
  0x19   : > { %2676 = vmatprep.mubr.msk.bf16.mxu0 %vm520_vm1, %v2917_v4  ;;  %v2920_v7 = vld [vmem:[%s3137_s29 + $0x18] sm:$0xff]   ;;  %v2921_v8 = vld [vmem:[%s3137_s29 + $0x20] sm:$0xff]   ;;  %v2926_v11 = vld [vmem:[%s3137_s29 + $0x48] sm:$0xff]  }
  0x1a   : > { %2677 = vmatmul.mubr.msk.bf16.vlgmr.msra.gmra.mrb[0].mxu0 %vm520_vm1, %v2918_v5  ;;  %v2925_v9 = vld [vmem:[%s3137_s29 + $0x40] sm:$0xff]   ;;  %v2927_v12 = vld [vmem:[%s3137_s29 + $0x50] sm:$0xff]   ;;  %v2922_v14 = vld [vmem:[%s3137_s29 + $0x28] sm:$0xff]   ;;  %p2952_p13 = pneg %p2951_p12 }
  0x1b   : > { %2680 = vmatprep.mubr.msk.bf16.mxu0 %vm520_vm1, %v2919_v6  ;;  %2692 = vmatprep.mubr.msk.bf16.mxu1 %vm520_vm1, %v2925_v9  ;;  %v2923_v15 = vld [vmem:[%s3137_s29 + $0x30] sm:$0xff]   ;;  %v2928_v16 = vld [vmem:[%s3137_s29 + $0x58] sm:$0xff]   ;;  %v2929_v17 = vld [vmem:[%s3137_s29 + $0x60] sm:$0xff]  }
  0x1c   : > { %2693 = vmatmul.mubr.msk.bf16.vlgmr.msra.gmra.mrb[0].mxu1 %vm520_vm1, %v2926_v11  ;;  %v2924_v18 = vld [vmem:[%s3137_s29 + $0x38] sm:$0xff]   ;;  %v2930_v19 = vld [vmem:[%s3137_s29 + $0x68] sm:$0xff]   ;;  %v2931_v20 = vld [vmem:[%s3137_s29 + $0x70] sm:$0xff]   ;;  %2749 = vmatpush3.bf16.msra.mxu0 %v2937_v23 }
  0x1d   : > { %2696 = vmatprep.mubr.msk.bf16.mxu1 %vm520_vm1, %v2927_v12  ;;  %2709 = vmatpush3.bf16.msra.mxu1 %v2933_v3  ;;  %v2932_v21 = vld [vmem:[%s3137_s29 + $0x78] sm:$0xff]   ;;  %s3013_s29 = smov [#allocation2]  }
  0x1e   : > { %2710 = vmatprep.subr.bf16.mxu1 %v2934_v10  ;;  %2750 = vmatprep.subr.bf16.mxu0 %v2938_v24  ;;  %s2953_s12 = sshll.u32 %s3013_s29, 4  ;;  %s2954_s12 = int_to_ptr.vmem [resolvable:$false] %s2953_s12 }
  0x1f   : > { %s2955_s14 = scalar_lea.vmem %s2954_s12, 4096  ;;  %p2956_p0 = scmp.lt.s32.totalorder %s3497_s15, %s2954_s12 }
  0x20   : > { %2751 = vmatpush3.bf16.msra.mxu0 %v2938_v24  ;;  %p2957_p1 = scmp.lt.s32.totalorder %s2955_s14, %s2949_s30 }
  0x21   : > { %2711 = vmatpush3.bf16.msra.mxu1 %v2934_v10  ;;  %2752 = vmatprep.subr.bf16.mxu0 %v2939_v25 }
  0x22   : > { %2681 = vmatmul.mubr.msk.bf16.gmra.mrb[4].mxu0 %vm520_vm1, %v2920_v7  ;;  %2712 = vmatprep.subr.bf16.mxu1 %v2935_v13  ;;  %p2958_p2 = por %p2957_p1, %p2956_p0 }
  0x23   : > { %2684 = vmatprep.mubr.msk.bf16.mxu0 %vm520_vm1, %v2921_v8 }
  0x24   : > { %2697 = vmatmul.mubr.msk.bf16.gmra.mrb[4].mxu1 %vm520_vm1, %v2928_v16  ;;  %2753 = vmatpush3.bf16.msra.mxu0 %v2939_v25  ;;  %p2959_p3 = pnand %p2958_p2, %p2952_p13 }
  0x25   : > { %2700 = vmatprep.mubr.msk.bf16.mxu1 %vm520_vm1, %v2929_v17  ;;  %2713 = vmatpush3.bf16.msra.mxu1 %v2935_v13 }
  0x26   : > { %2714 = vmatprep.subr.bf16.mxu1 %v2936_v22 }
  0x29   : > { %2715 = vmatpush3.bf16.msra.mxu1 %v2936_v22 }
  0x2a   : > { %2685 = vmatmul.mubr.msk.bf16.gmra.mrb[8].mxu0 %vm520_vm1, %v2922_v14 }
  0x2b   : > { %2688 = vmatprep.mubr.msk.bf16.mxu0 %vm520_vm1, %v2923_v15 }
  0x2c   : > { %2701 = vmatmul.mubr.msk.bf16.gmra.mrb[8].mxu1 %vm520_vm1, %v2930_v19 }
  0x2d   : > { %2704 = vmatprep.mubr.msk.bf16.mxu1 %vm520_vm1, %v2931_v20 }
  0x32   : > { %2689 = vmatmul.mubr.msk.bf16.gmra.mrb[12].mxu0 %vm520_vm1, %v2924_v18 }
  0x34   : > { %2705 = vmatmul.mubr.msk.bf16.gmra.mrb[12].mxu1 %vm520_vm1, %v2932_v21 }
  0xed   : > { %v2678_v27 = vpop.f32.mrb[0].mxu0 }
  0xee   : > { %v616_v28 = vadd.f32 %v2678_v27, %v3192_v26  ;;  %v607_v29 = vpop.f32.mrb[1].mxu0 }
  0xef   : > { %v608_v30 = vadd.f32 %v3192_v26, %v607_v29  ;;  %v2679_v31 = vpop.f32.mrb[2].mxu0  ;;  %v2694_v44 = vpop.f32.mrb[0].mxu1 }
  0xf0   : > { %v736_v32 = vmul.f32 0.2, %v616_v28  ;;  %v619_v33 = vadd.f32 %v2679_v31, %v3192_v26  ;;  %v610_v34 = vpop.f32.mrb[3].mxu0  ;;  %v680_v48 = vadd.f32 %v2694_v44, %v3192_v26  ;;  %v671_v49 = vpop.f32.mrb[1].mxu1 }
  0xf1   : > { %v734_v35 = vmul.f32 0.2, %v608_v30  ;;  %v611_v36 = vadd.f32 %v3192_v26, %v610_v34  ;;  %v672_v53 = vadd.f32 %v3192_v26, %v671_v49  ;;  %v2695_v54 = vpop.f32.mrb[2].mxu1 }
  0xf2   : > { %v737_v37 = vmul.f32 0.2, %v619_v33  ;;  %v768_v39 = vmax.f32 %v616_v28, %v736_v32  ;;  %v752_v58 = vmul.f32 0.2, %v680_v48  ;;  %v683_v59 = vadd.f32 %v2695_v54, %v3192_v26  ;;  %v674_v60 = vpop.f32.mrb[3].mxu1 }
  0xf3   : > { %v735_v38 = vmul.f32 0.2, %v611_v36  ;;  %v766_v41 = vmax.f32 %v608_v30, %v734_v35  ;;  %v750_v63 = vmul.f32 0.2, %v672_v53  ;;  %v675_v0 = vadd.f32 %v3192_v26, %v674_v60 }
  0xf4   : > { %v769_v40 = vmax.f32 %v619_v33, %v737_v37  ;;  %v784_v2 = vmax.f32 %v680_v48, %v752_v58  ;;  %v753_v3 = vmul.f32 0.2, %v683_v59 }
  0xf5   : > { %v767_v42 = vmax.f32 %v611_v36, %v735_v38  ;;  %v2682_v43 = vpop.f32.mrb[4].mxu0  ;;  %v782_v5 = vmax.f32 %v672_v53, %v750_v63  ;;  %v751_v6 = vmul.f32 0.2, %v675_v0 }
  0xf6   : > { %v808_v45 = vpack.c.bf16 %v769_v40, %v768_v39  ;;  %v632_v46 = vadd.f32 %v2682_v43, %v3192_v26  ;;  %v623_v47 = vpop.f32.mrb[5].mxu0  ;;  %v785_v9 = vmax.f32 %v683_v59, %v753_v3 }
  0xf7   : > { %v807_v50 = vpack.c.bf16 %v767_v42, %v766_v41  ;;  %v624_v51 = vadd.f32 %v3192_v26, %v623_v47  ;;  %v2683_v52 = vpop.f32.mrb[6].mxu0  ;;  %v783_v13 = vmax.f32 %v675_v0, %v751_v6  ;;  %v2698_v14 = vpop.f32.mrb[4].mxu1 }
  0xf8   : > { %v740_v55 = vmul.f32 0.2, %v632_v46  ;;  %v635_v56 = vadd.f32 %v2683_v52, %v3192_v26  ;;  %v626_v57 = vpop.f32.mrb[7].mxu0  ;;  %v3209_v18 = vpack.c.bf16 %v785_v9, %v784_v2  ;;  %v696_v19 = vadd.f32 %v2698_v14, %v3192_v26  ;;  %v687_v20 = vpop.f32.mrb[5].mxu1 }
  0xf9   : > { %v738_v61 = vmul.f32 0.2, %v624_v51  ;;  %v627_v62 = vadd.f32 %v3192_v26, %v626_v57  ;;  %2716 = vmatprep.mubr.msk.bf16.mxu1 %vm853_vm2, %v807_v50  ;;  %v3213_v24 = vpack.c.bf16 %v783_v13, %v782_v5  ;;  %v688_v25 = vadd.f32 %v3192_v26, %v687_v20  ;;  %v2699_v27 = vpop.f32.mrb[6].mxu1 }
  0xfa   : > { %v741_v1 = vmul.f32 0.2, %v635_v56  ;;  %2717 = vmatmul.mubr.msk.bf16.vlgmr.msra.gmra.mrb[16].mxu1 %vm853_vm2, %v808_v45  ;;  %v772_v7 = vmax.f32 %v632_v46, %v740_v55  ;;  %v756_v31 = vmul.f32 0.2, %v696_v19  ;;  %v699_v32 = vadd.f32 %v2699_v27, %v3192_v26  ;;  %v690_v33 = vpop.f32.mrb[7].mxu1 }
  0xfb   : > { %v739_v4 = vmul.f32 0.2, %v627_v62  ;;  %v770_v10 = vmax.f32 %v624_v51, %v738_v61  ;;  %v754_v36 = vmul.f32 0.2, %v688_v25  ;;  %v691_v37 = vadd.f32 %v3192_v26, %v690_v33 }
  0xfc   : > { %v773_v8 = vmax.f32 %v635_v56, %v741_v1  ;;  %v788_v39 = vmax.f32 %v696_v19, %v756_v31  ;;  %v757_v40 = vmul.f32 0.2, %v699_v32 }
  0xfd   : > { %v771_v11 = vmax.f32 %v627_v62, %v739_v4  ;;  %v2686_v12 = vpop.f32.mrb[8].mxu0  ;;  %v786_v42 = vmax.f32 %v688_v25, %v754_v36  ;;  %v755_v43 = vmul.f32 0.2, %v691_v37 }
  0xfe   : > { %v810_v15 = vpack.c.bf16 %v773_v8, %v772_v7  ;;  %v648_v16 = vadd.f32 %v2686_v12, %v3192_v26  ;;  %v639_v17 = vpop.f32.mrb[9].mxu0  ;;  %v789_v46 = vmax.f32 %v699_v32, %v757_v40 }
  0xff   : > { %v809_v21 = vpack.c.bf16 %v771_v11, %v770_v10  ;;  %v640_v22 = vadd.f32 %v3192_v26, %v639_v17  ;;  %v2687_v23 = vpop.f32.mrb[10].mxu0  ;;  %v787_v50 = vmax.f32 %v691_v37, %v755_v43  ;;  %v2702_v51 = vpop.f32.mrb[8].mxu1 }
 0x100   : > { %v744_v28 = vmul.f32 0.2, %v648_v16  ;;  %v651_v29 = vadd.f32 %v2687_v23, %v3192_v26  ;;  %v642_v30 = vpop.f32.mrb[11].mxu0  ;;  %v818_v55 = vpack.c.bf16 %v789_v46, %v788_v39  ;;  %v712_v56 = vadd.f32 %v2702_v51, %v3192_v26  ;;  %v703_v57 = vpop.f32.mrb[9].mxu1 }
 0x101   : > { %v742_v34 = vmul.f32 0.2, %v640_v22  ;;  %v643_v35 = vadd.f32 %v3192_v26, %v642_v30  ;;  %2720 = vmatprep.mubr.msk.bf16.mxu1 %vm853_vm2, %v809_v21  ;;  %v817_v61 = vpack.c.bf16 %v787_v50, %v786_v42  ;;  %v704_v62 = vadd.f32 %v3192_v26, %v703_v57  ;;  %v2703_v63 = vpop.f32.mrb[10].mxu1 }
 0x102   : > { %v745_v38 = vmul.f32 0.2, %v651_v29  ;;  %2721 = vmatmul.mubr.msk.bf16.gmra.mrb[20].mxu1 %vm853_vm2, %v810_v15  ;;  %v776_v44 = vmax.f32 %v648_v16, %v744_v28  ;;  %v760_v3 = vmul.f32 0.2, %v712_v56  ;;  %v715_v4 = vadd.f32 %v2703_v63, %v3192_v26  ;;  %v706_v5 = vpop.f32.mrb[11].mxu1 }
 0x103   : > { %v743_v41 = vmul.f32 0.2, %v643_v35  ;;  %v774_v47 = vmax.f32 %v640_v22, %v742_v34  ;;  %v758_v8 = vmul.f32 0.2, %v704_v62  ;;  %v707_v9 = vadd.f32 %v3192_v26, %v706_v5 }
 0x104   : > { %v777_v45 = vmax.f32 %v651_v29, %v745_v38  ;;  %v792_v11 = vmax.f32 %v712_v56, %v760_v3  ;;  %v761_v12 = vmul.f32 0.2, %v715_v4 }
 0x105   : > { %v775_v48 = vmax.f32 %v643_v35, %v743_v41  ;;  %v2690_v49 = vpop.f32.mrb[12].mxu0  ;;  %v790_v14 = vmax.f32 %v704_v62, %v758_v8  ;;  %v759_v15 = vmul.f32 0.2, %v707_v9 }
 0x106   : > { %v812_v52 = vpack.c.bf16 %v777_v45, %v776_v44  ;;  %v664_v53 = vadd.f32 %v2690_v49, %v3192_v26  ;;  %v655_v54 = vpop.f32.mrb[13].mxu0  ;;  %v793_v19 = vmax.f32 %v715_v4, %v761_v12  ;;  %v3266_v49 = vld [vmem:[%s3548_s4] ss:$0 sm:$0xff] }
 0x107   : > { %v811_v58 = vpack.c.bf16 %v775_v48, %v774_v47  ;;  %v656_v59 = vadd.f32 %v3192_v26, %v655_v54  ;;  %v2691_v60 = vpop.f32.mrb[14].mxu0  ;;  %v791_v22 = vmax.f32 %v707_v9, %v759_v15  ;;  %v2706_v23 = vpop.f32.mrb[12].mxu1  ;;  %v2943_v47 = vld [vmem:[%s3551_s7 + $0x10] sm:$0xff]   ;;  %v2944_v48 = vld [vmem:[%s3551_s7 + $0x18] sm:$0xff]  }
 0x108   : > { %v748_v0 = vmul.f32 0.2, %v664_v53  ;;  %v667_v1 = vadd.f32 %v2691_v60, %v3192_v26  ;;  %v658_v2 = vpop.f32.mrb[15].mxu0  ;;  %v820_v27 = vpack.c.bf16 %v793_v19, %v792_v11  ;;  %v728_v28 = vadd.f32 %v2706_v23, %v3192_v26  ;;  %v719_v29 = vpop.f32.mrb[13].mxu1 }
 0x109   : > { %v746_v6 = vmul.f32 0.2, %v656_v59  ;;  %v659_v7 = vadd.f32 %v3192_v26, %v658_v2  ;;  %2724 = vmatprep.mubr.msk.bf16.mxu1 %vm853_vm2, %v811_v58  ;;  %v819_v31 = vpack.c.bf16 %v791_v22, %v790_v14  ;;  %v720_v32 = vadd.f32 %v3192_v26, %v719_v29  ;;  %v2707_v33 = vpop.f32.mrb[14].mxu1 }
 0x10a   : > { %v749_v10 = vmul.f32 0.2, %v667_v1  ;;  %2725 = vmatmul.mubr.msk.bf16.gmra.mrb[24].mxu1 %vm853_vm2, %v812_v52  ;;  %v780_v16 = vmax.f32 %v664_v53, %v748_v0  ;;  %v764_v34 = vmul.f32 0.2, %v728_v28  ;;  %v731_v35 = vadd.f32 %v2707_v33, %v3192_v26  ;;  %v722_v36 = vpop.f32.mrb[15].mxu1 }
 0x10b   : > { %v747_v13 = vmul.f32 0.2, %v659_v7  ;;  %v778_v20 = vmax.f32 %v656_v59, %v746_v6  ;;  %v762_v37 = vmul.f32 0.2, %v720_v32  ;;  %v723_v38 = vadd.f32 %v3192_v26, %v722_v36  ;;  %v2940_v26 = vld [vmem:[%s3549_s5 + $0x18] sm:$0xff]  }
 0x10c   : > { %v781_v17 = vmax.f32 %v667_v1, %v749_v10  ;;  %v796_v39 = vmax.f32 %v728_v28, %v764_v34  ;;  %v765_v40 = vmul.f32 0.2, %v731_v35  ;;  %2754 = vmatprep.subr.bf16.mxu0 %v2940_v26 }
 0x10d   : > { %v779_v21 = vmax.f32 %v659_v7, %v747_v13  ;;  %v794_v41 = vmax.f32 %v720_v32, %v762_v37  ;;  %v763_v42 = vmul.f32 0.2, %v723_v38  ;;  %2755 = vmatpush3.bf16.msra.mxu0 %v2940_v26 }
 0x10e   : > { %v814_v25 = vpack.c.bf16 %v781_v17, %v780_v16  ;;  %v797_v43 = vmax.f32 %v731_v35, %v765_v40 }
 0x10f   : > { %v813_v30 = vpack.c.bf16 %v779_v21, %v778_v20  ;;  %v795_v44 = vmax.f32 %v723_v38, %v763_v42 }
 0x110   : > { %v822_v45 = vpack.c.bf16 %v797_v43, %v796_v39 }
 0x111   : > { %2728 = vmatprep.mubr.msk.bf16.mxu1 %vm853_vm2, %v813_v30  ;;  %v821_v46 = vpack.c.bf16 %v795_v44, %v794_v41 }
 0x112   : > { %2729 = vmatmul.mubr.msk.bf16.gmra.mrb[28].mxu1 %vm853_vm2, %v814_v25 }
 0x113   : > { %2732 = vmatprep.mubr.msk.bf16.mxu1 %vm853_vm2, %v3213_v24  ;;  %v2942_v24 = vld [vmem:[%s3551_s7 + $0x8] sm:$0xff]  }
 0x11a   : > { %2733 = vmatmul.mubr.msk.bf16.gmra.mrb[32].mxu1 %vm853_vm2, %v3209_v18  ;;  %v2941_v18 = vld [vmem:[%s3551_s7] sm:$0xff]  }
 0x11b   : > { %2736 = vmatprep.mubr.msk.bf16.mxu1 %vm853_vm2, %v817_v61  ;;  %2788 = vmatprep.subr.bf16.mxu1 %v2941_v18 }
 0x11c   : > { %2789 = vmatpush3.bf16.msra.mxu1 %v2941_v18 }
 0x11d   : > { %2790 = vmatprep.subr.bf16.mxu1 %v2942_v24 }
 0x120   : > { %2791 = vmatpush3.bf16.msra.mxu1 %v2942_v24 }
 0x121   : > { %2792 = vmatprep.subr.bf16.mxu1 %v2943_v47 }
 0x122   : > { %2737 = vmatmul.mubr.msk.bf16.gmra.mrb[36].mxu1 %vm853_vm2, %v818_v55 }
 0x123   : > { %2740 = vmatprep.mubr.msk.bf16.mxu1 %vm853_vm2, %v819_v31 }
 0x124   : > { %2793 = vmatpush3.bf16.msra.mxu1 %v2943_v47 }
 0x125   : > { %2794 = vmatprep.subr.bf16.mxu1 %v2944_v48 }
 0x128   : > { %2795 = vmatpush3.bf16.msra.mxu1 %v2944_v48 }
 0x12a   : > { %2741 = vmatmul.mubr.msk.bf16.gmra.mrb[40].mxu1 %vm853_vm2, %v820_v27 }
 0x12b   : > { %2744 = vmatprep.mubr.msk.bf16.mxu1 %vm853_vm2, %v821_v46 }
 0x132   : > { %2745 = vmatmul.mubr.msk.bf16.gmra.mrb[44].mxu1 %vm853_vm2, %v822_v45 }
 0x1cd   : > { %v2718_v50 = vpop.f32.mrb[16].mxu1 }
 0x1ce   : > { %v945_v51 = vadd.f32 %v2718_v50, %v3266_v49  ;;  %v936_v52 = vpop.f32.mrb[17].mxu1 }
 0x1cf   : > { %v937_v53 = vadd.f32 %v3266_v49, %v936_v52  ;;  %v2719_v54 = vpop.f32.mrb[18].mxu1 }
 0x1d0   : > { %v1065_v55 = vmul.f32 0.2, %v945_v51  ;;  %v948_v56 = vadd.f32 %v2719_v54, %v3266_v49  ;;  %v939_v57 = vpop.f32.mrb[19].mxu1 }
 0x1d1   : > { %v1063_v58 = vmul.f32 0.2, %v937_v53  ;;  %v940_v59 = vadd.f32 %v3266_v49, %v939_v57 }
 0x1d2   : > { %v1066_v60 = vmul.f32 0.2, %v948_v56  ;;  %v1097_v62 = vmax.f32 %v945_v51, %v1065_v55 }
 0x1d3   : > { %v1064_v61 = vmul.f32 0.2, %v940_v59  ;;  %v1095_v0 = vmax.f32 %v937_v53, %v1063_v58 }
 0x1d4   : > { %v1098_v63 = vmax.f32 %v948_v56, %v1066_v60 }
 0x1d5   : > { %v1096_v1 = vmax.f32 %v940_v59, %v1064_v61  ;;  %v2722_v2 = vpop.f32.mrb[20].mxu1 }
 0x1d6   : > { %v1137_v3 = vpack.c.bf16 %v1098_v63, %v1097_v62  ;;  %v961_v4 = vadd.f32 %v2722_v2, %v3266_v49  ;;  %v952_v5 = vpop.f32.mrb[21].mxu1 }
 0x1d7   : > { %v1136_v6 = vpack.c.bf16 %v1096_v1, %v1095_v0  ;;  %v953_v7 = vadd.f32 %v3266_v49, %v952_v5  ;;  %v2723_v8 = vpop.f32.mrb[22].mxu1 }
 0x1d8   : > { %v1069_v9 = vmul.f32 0.2, %v961_v4  ;;  %v964_v10 = vadd.f32 %v2723_v8, %v3266_v49  ;;  %v955_v11 = vpop.f32.mrb[23].mxu1 }
 0x1d9   : > { %v1067_v12 = vmul.f32 0.2, %v953_v7  ;;  %v956_v13 = vadd.f32 %v3266_v49, %v955_v11  ;;  %2756 = vmatprep.mubr.msk.bf16.mxu0 %vm853_vm2, %v1136_v6 }
 0x1da   : > { %v1070_v14 = vmul.f32 0.2, %v964_v10  ;;  %2757 = vmatmul.mubr.msk.bf16.vlgmr.msra.gmra.mrb[16].mxu0 %vm853_vm2, %v1137_v3  ;;  %v1101_v16 = vmax.f32 %v961_v4, %v1069_v9 }
 0x1db   : > { %v1068_v15 = vmul.f32 0.2, %v956_v13  ;;  %v1099_v19 = vmax.f32 %v953_v7, %v1067_v12 }
 0x1dc   : > { %v1102_v17 = vmax.f32 %v964_v10, %v1070_v14 }
 0x1dd   : > { %v1100_v20 = vmax.f32 %v956_v13, %v1068_v15  ;;  %v2726_v21 = vpop.f32.mrb[24].mxu1 }
 0x1de   : > { %v1139_v22 = vpack.c.bf16 %v1102_v17, %v1101_v16  ;;  %v977_v23 = vadd.f32 %v2726_v21, %v3266_v49  ;;  %v968_v25 = vpop.f32.mrb[25].mxu1 }
 0x1df   : > { %v1138_v27 = vpack.c.bf16 %v1100_v20, %v1099_v19  ;;  %v969_v28 = vadd.f32 %v3266_v49, %v968_v25  ;;  %v2727_v29 = vpop.f32.mrb[26].mxu1 }
 0x1e0   : > { %v1073_v30 = vmul.f32 0.2, %v977_v23  ;;  %v980_v31 = vadd.f32 %v2727_v29, %v3266_v49  ;;  %v971_v32 = vpop.f32.mrb[27].mxu1 }
 0x1e1   : > { %v1071_v33 = vmul.f32 0.2, %v969_v28  ;;  %v972_v34 = vadd.f32 %v3266_v49, %v971_v32  ;;  %2760 = vmatprep.mubr.msk.bf16.mxu0 %vm853_vm2, %v1138_v27 }
 0x1e2   : > { %v1074_v35 = vmul.f32 0.2, %v980_v31  ;;  %2761 = vmatmul.mubr.msk.bf16.gmra.mrb[20].mxu0 %vm853_vm2, %v1139_v22  ;;  %v1105_v37 = vmax.f32 %v977_v23, %v1073_v30 }
 0x1e3   : > { %v1072_v36 = vmul.f32 0.2, %v972_v34  ;;  %v1103_v39 = vmax.f32 %v969_v28, %v1071_v33 }
 0x1e4   : > { %v1106_v38 = vmax.f32 %v980_v31, %v1074_v35 }
 0x1e5   : > { %v1104_v40 = vmax.f32 %v972_v34, %v1072_v36  ;;  %v2730_v41 = vpop.f32.mrb[28].mxu1 }
 0x1e6   : > { %v1141_v42 = vpack.c.bf16 %v1106_v38, %v1105_v37  ;;  %v993_v43 = vadd.f32 %v2730_v41, %v3266_v49  ;;  %v984_v44 = vpop.f32.mrb[29].mxu1 }
 0x1e7   : > { %v1140_v45 = vpack.c.bf16 %v1104_v40, %v1103_v39  ;;  %v985_v46 = vadd.f32 %v3266_v49, %v984_v44  ;;  %v2731_v26 = vpop.f32.mrb[30].mxu1 }
 0x1e8   : > { %v1077_v18 = vmul.f32 0.2, %v993_v43  ;;  %v996_v24 = vadd.f32 %v2731_v26, %v3266_v49  ;;  %v987_v47 = vpop.f32.mrb[31].mxu1 }
 0x1e9   : > { %v1075_v48 = vmul.f32 0.2, %v985_v46  ;;  %v988_v50 = vadd.f32 %v3266_v49, %v987_v47  ;;  %2764 = vmatprep.mubr.msk.bf16.mxu0 %vm853_vm2, %v1140_v45 }
 0x1ea   : > { %v1078_v51 = vmul.f32 0.2, %v996_v24  ;;  %2765 = vmatmul.mubr.msk.bf16.gmra.mrb[24].mxu0 %vm853_vm2, %v1141_v42  ;;  %v1109_v53 = vmax.f32 %v993_v43, %v1077_v18 }
 0x1eb   : > { %v1076_v52 = vmul.f32 0.2, %v988_v50  ;;  %v1107_v55 = vmax.f32 %v985_v46, %v1075_v48 }
 0x1ec   : > { %v1110_v54 = vmax.f32 %v996_v24, %v1078_v51 }
 0x1ed   : > { %v1108_v56 = vmax.f32 %v988_v50, %v1076_v52  ;;  %v2734_v57 = vpop.f32.mrb[32].mxu1 }
 0x1ee   : > { %v1143_v58 = vpack.c.bf16 %v1110_v54, %v1109_v53  ;;  %v1009_v59 = vadd.f32 %v2734_v57, %v3266_v49  ;;  %v1000_v60 = vpop.f32.mrb[33].mxu1 }
 0x1ef   : > { %v1142_v61 = vpack.c.bf16 %v1108_v56, %v1107_v55  ;;  %v1001_v62 = vadd.f32 %v3266_v49, %v1000_v60  ;;  %v2735_v63 = vpop.f32.mrb[34].mxu1 }
 0x1f0   : > { %v1081_v0 = vmul.f32 0.2, %v1009_v59  ;;  %v1012_v1 = vadd.f32 %v2735_v63, %v3266_v49  ;;  %v1003_v2 = vpop.f32.mrb[35].mxu1 }
 0x1f1   : > { %v1079_v3 = vmul.f32 0.2, %v1001_v62  ;;  %v1004_v4 = vadd.f32 %v3266_v49, %v1003_v2  ;;  %2768 = vmatprep.mubr.msk.bf16.mxu0 %vm853_vm2, %v1142_v61 }
 0x1f2   : > { %v1082_v5 = vmul.f32 0.2, %v1012_v1  ;;  %2769 = vmatmul.mubr.msk.bf16.gmra.mrb[28].mxu0 %vm853_vm2, %v1143_v58  ;;  %v1113_v7 = vmax.f32 %v1009_v59, %v1081_v0 }
 0x1f3   : > { %v1080_v6 = vmul.f32 0.2, %v1004_v4  ;;  %v1111_v9 = vmax.f32 %v1001_v62, %v1079_v3 }
 0x1f4   : > { %v1114_v8 = vmax.f32 %v1012_v1, %v1082_v5  ;;  %v2947_v5 = vld [vmem:[%s3553_s9 + $0x10] sm:$0xff]  }
 0x1f5   : > { %v1112_v10 = vmax.f32 %v1004_v4, %v1080_v6  ;;  %v2738_v11 = vpop.f32.mrb[36].mxu1  ;;  %v2946_v4 = vld [vmem:[%s3553_s9 + $0x8] sm:$0xff]   ;;  %v2948_v6 = vld [vmem:[%s3553_s9 + $0x18] sm:$0xff]  }
 0x1f6   : > { %v1145_v12 = vpack.c.bf16 %v1114_v8, %v1113_v7  ;;  %v1025_v13 = vadd.f32 %v2738_v11, %v3266_v49  ;;  %v1016_v14 = vpop.f32.mrb[37].mxu1  ;;  %v3331_v7 = vld [vmem:[%s3550_s6] ss:$0 sm:$0xff] }
 0x1f7   : > { %v1144_v15 = vpack.c.bf16 %v1112_v10, %v1111_v9  ;;  %v1017_v16 = vadd.f32 %v3266_v49, %v1016_v14  ;;  %v2739_v17 = vpop.f32.mrb[38].mxu1 }
 0x1f8   : > { %v1085_v19 = vmul.f32 0.2, %v1025_v13  ;;  %v1028_v20 = vadd.f32 %v2739_v17, %v3266_v49  ;;  %v1019_v21 = vpop.f32.mrb[39].mxu1 }
 0x1f9   : > { %v1083_v22 = vmul.f32 0.2, %v1017_v16  ;;  %v1020_v23 = vadd.f32 %v3266_v49, %v1019_v21  ;;  %2772 = vmatprep.mubr.msk.bf16.mxu0 %vm853_vm2, %v1144_v15 }
 0x1fa   : > { %v1086_v25 = vmul.f32 0.2, %v1028_v20  ;;  %2773 = vmatmul.mubr.msk.bf16.gmra.mrb[32].mxu0 %vm853_vm2, %v1145_v12  ;;  %v1117_v28 = vmax.f32 %v1025_v13, %v1085_v19 }
 0x1fb   : > { %v1084_v27 = vmul.f32 0.2, %v1020_v23  ;;  %v1115_v30 = vmax.f32 %v1017_v16, %v1083_v22 }
 0x1fc   : > { %v1118_v29 = vmax.f32 %v1028_v20, %v1086_v25 }
 0x1fd   : > { %v1116_v31 = vmax.f32 %v1020_v23, %v1084_v27  ;;  %v2742_v32 = vpop.f32.mrb[40].mxu1 }
 0x1fe   : > { %v1147_v33 = vpack.c.bf16 %v1118_v29, %v1117_v28  ;;  %v1041_v34 = vadd.f32 %v2742_v32, %v3266_v49  ;;  %v1032_v35 = vpop.f32.mrb[41].mxu1 }
 0x1ff   : > { %v1146_v36 = vpack.c.bf16 %v1116_v31, %v1115_v30  ;;  %v1033_v37 = vadd.f32 %v3266_v49, %v1032_v35  ;;  %v2743_v38 = vpop.f32.mrb[42].mxu1 }
 0x200   : > { %v1089_v39 = vmul.f32 0.2, %v1041_v34  ;;  %v1044_v40 = vadd.f32 %v2743_v38, %v3266_v49  ;;  %v1035_v41 = vpop.f32.mrb[43].mxu1 }
 0x201   : > { %v1087_v42 = vmul.f32 0.2, %v1033_v37  ;;  %v1036_v43 = vadd.f32 %v3266_v49, %v1035_v41  ;;  %2776 = vmatprep.mubr.msk.bf16.mxu0 %vm853_vm2, %v1146_v36 }
 0x202   : > { %v1090_v44 = vmul.f32 0.2, %v1044_v40  ;;  %2777 = vmatmul.mubr.msk.bf16.gmra.mrb[36].mxu0 %vm853_vm2, %v1147_v33  ;;  %v1121_v46 = vmax.f32 %v1041_v34, %v1089_v39 }
 0x203   : > { %v1088_v45 = vmul.f32 0.2, %v1036_v43  ;;  %v1119_v18 = vmax.f32 %v1033_v37, %v1087_v42 }
 0x204   : > { %v1122_v26 = vmax.f32 %v1044_v40, %v1090_v44 }
 0x205   : > { %v1120_v24 = vmax.f32 %v1036_v43, %v1088_v45  ;;  %v2746_v47 = vpop.f32.mrb[44].mxu1 }
 0x206   : > { %v1149_v48 = vpack.c.bf16 %v1122_v26, %v1121_v46  ;;  %v1057_v50 = vadd.f32 %v2746_v47, %v3266_v49  ;;  %v1048_v51 = vpop.f32.mrb[45].mxu1 }
 0x207   : > { %v1148_v52 = vpack.c.bf16 %v1120_v24, %v1119_v18  ;;  %v1049_v53 = vadd.f32 %v3266_v49, %v1048_v51  ;;  %v2747_v54 = vpop.f32.mrb[46].mxu1 }
 0x208   : > { %v1093_v55 = vmul.f32 0.2, %v1057_v50  ;;  %v1060_v56 = vadd.f32 %v2747_v54, %v3266_v49  ;;  %v1051_v57 = vpop.f32.mrb[47].mxu1 }
 0x209   : > { %v1091_v58 = vmul.f32 0.2, %v1049_v53  ;;  %v1052_v59 = vadd.f32 %v3266_v49, %v1051_v57  ;;  %2780 = vmatprep.mubr.msk.bf16.mxu0 %vm853_vm2, %v1148_v52  ;;  %v2945_v49 = vld [vmem:[%s3553_s9] sm:$0xff]  }
 0x20a   : > { %v1094_v60 = vmul.f32 0.2, %v1060_v56  ;;  %2781 = vmatmul.mubr.msk.bf16.gmra.mrb[40].mxu0 %vm853_vm2, %v1149_v48  ;;  %v1125_v62 = vmax.f32 %v1057_v50, %v1093_v55  ;;  %2828 = vmatprep.subr.bf16.mxu0 %v2945_v49 }
 0x20b   : > { %v1092_v61 = vmul.f32 0.2, %v1052_v59  ;;  %v1123_v0 = vmax.f32 %v1049_v53, %v1091_v58  ;;  %2829 = vmatpush3.bf16.msra.mxu0 %v2945_v49 }
 0x20c   : > { %v1126_v63 = vmax.f32 %v1060_v56, %v1094_v60  ;;  %2830 = vmatprep.subr.bf16.mxu0 %v2946_v4 }
 0x20d   : > { %v1124_v1 = vmax.f32 %v1052_v59, %v1092_v61 }
 0x20e   : > { %v1151_v2 = vpack.c.bf16 %v1126_v63, %v1125_v62 }
 0x20f   : > { %v1150_v3 = vpack.c.bf16 %v1124_v1, %v1123_v0  ;;  %2831 = vmatpush3.bf16.msra.mxu0 %v2946_v4 }
 0x210   : > { %2832 = vmatprep.subr.bf16.mxu0 %v2947_v5 }
 0x211   : > { %2784 = vmatprep.mubr.msk.bf16.mxu0 %vm853_vm2, %v1150_v3 }
 0x212   : > { %2785 = vmatmul.mubr.msk.bf16.gmra.mrb[44].mxu0 %vm853_vm2, %v1151_v2 }
 0x213   : > { %2833 = vmatpush3.bf16.msra.mxu0 %v2947_v5 }
 0x214   : > { %2834 = vmatprep.subr.bf16.mxu0 %v2948_v6 }
 0x217   : > { %2835 = vmatpush3.bf16.msra.mxu0 %v2948_v6 }
 0x2ad   : > { %v2758_v8 = vpop.f32.mrb[16].mxu0 }
 0x2ae   : > { %v1273_v9 = vadd.f32 %v2758_v8, %v3331_v7  ;;  %v1264_v10 = vpop.f32.mrb[17].mxu0 }
 0x2af   : > { %v1265_v11 = vadd.f32 %v3331_v7, %v1264_v10  ;;  %v2759_v12 = vpop.f32.mrb[18].mxu0 }
 0x2b0   : > { %v1393_v13 = vmul.f32 0.2, %v1273_v9  ;;  %v1276_v14 = vadd.f32 %v2759_v12, %v3331_v7  ;;  %v1267_v15 = vpop.f32.mrb[19].mxu0 }
 0x2b1   : > { %v1391_v16 = vmul.f32 0.2, %v1265_v11  ;;  %v1268_v17 = vadd.f32 %v3331_v7, %v1267_v15 }
 0x2b2   : > { %v1394_v19 = vmul.f32 0.2, %v1276_v14  ;;  %v1425_v21 = vmax.f32 %v1273_v9, %v1393_v13 }
 0x2b3   : > { %v1392_v20 = vmul.f32 0.2, %v1268_v17  ;;  %v1423_v23 = vmax.f32 %v1265_v11, %v1391_v16 }
 0x2b4   : > { %v1426_v22 = vmax.f32 %v1276_v14, %v1394_v19 }
 0x2b5   : > { %v1424_v25 = vmax.f32 %v1268_v17, %v1392_v20  ;;  %v2762_v27 = vpop.f32.mrb[20].mxu0 }
 0x2b6   : > { %v1465_v28 = vpack.c.bf16 %v1426_v22, %v1425_v21  ;;  %v1289_v29 = vadd.f32 %v2762_v27, %v3331_v7  ;;  %v1280_v30 = vpop.f32.mrb[21].mxu0 }
 0x2b7   : > { %v1464_v31 = vpack.c.bf16 %v1424_v25, %v1423_v23  ;;  %v1281_v32 = vadd.f32 %v3331_v7, %v1280_v30  ;;  %v2763_v33 = vpop.f32.mrb[22].mxu0 }
 0x2b8   : > { %v1397_v34 = vmul.f32 0.2, %v1289_v29  ;;  %v1292_v35 = vadd.f32 %v2763_v33, %v3331_v7  ;;  %v1283_v36 = vpop.f32.mrb[23].mxu0 }
 0x2b9   : > { %v1395_v37 = vmul.f32 0.2, %v1281_v32  ;;  %v1284_v38 = vadd.f32 %v3331_v7, %v1283_v36  ;;  %2796 = vmatprep.mubr.msk.bf16.mxu1 %vm853_vm2, %v1464_v31 }
 0x2ba   : > { %v1398_v39 = vmul.f32 0.2, %v1292_v35  ;;  %2797 = vmatmul.mubr.msk.bf16.vlgmr.msra.gmra.mrb[48].mxu1 %vm853_vm2, %v1465_v28  ;;  %v1429_v41 = vmax.f32 %v1289_v29, %v1397_v34 }
 0x2bb   : > { %v1396_v40 = vmul.f32 0.2, %v1284_v38  ;;  %v1427_v43 = vmax.f32 %v1281_v32, %v1395_v37 }
 0x2bc   : > { %v1430_v42 = vmax.f32 %v1292_v35, %v1398_v39 }
 0x2bd   : > { %v1428_v44 = vmax.f32 %v1284_v38, %v1396_v40  ;;  %v2766_v45 = vpop.f32.mrb[24].mxu0 }
 0x2be   : > { %v1467_v46 = vpack.c.bf16 %v1430_v42, %v1429_v41  ;;  %v1305_v26 = vadd.f32 %v2766_v45, %v3331_v7  ;;  %v1296_v18 = vpop.f32.mrb[25].mxu0 }
 0x2bf   : > { %v1466_v24 = vpack.c.bf16 %v1428_v44, %v1427_v43  ;;  %v1297_v47 = vadd.f32 %v3331_v7, %v1296_v18  ;;  %v2767_v48 = vpop.f32.mrb[26].mxu0 }
 0x2c0   : > { %v1401_v50 = vmul.f32 0.2, %v1305_v26  ;;  %v1308_v51 = vadd.f32 %v2767_v48, %v3331_v7  ;;  %v1299_v52 = vpop.f32.mrb[27].mxu0 }
 0x2c1   : > { %v1399_v53 = vmul.f32 0.2, %v1297_v47  ;;  %v1300_v54 = vadd.f32 %v3331_v7, %v1299_v52  ;;  %2800 = vmatprep.mubr.msk.bf16.mxu1 %vm853_vm2, %v1466_v24 }
 0x2c2   : > { %v1402_v55 = vmul.f32 0.2, %v1308_v51  ;;  %2801 = vmatmul.mubr.msk.bf16.gmra.mrb[52].mxu1 %vm853_vm2, %v1467_v46  ;;  %v1433_v57 = vmax.f32 %v1305_v26, %v1401_v50 }
 0x2c3   : > { %v1400_v56 = vmul.f32 0.2, %v1300_v54  ;;  %v1431_v59 = vmax.f32 %v1297_v47, %v1399_v53 }
 0x2c4   : > { %v1434_v58 = vmax.f32 %v1308_v51, %v1402_v55 }
 0x2c5   : > { %v1432_v60 = vmax.f32 %v1300_v54, %v1400_v56  ;;  %v2770_v61 = vpop.f32.mrb[28].mxu0 }
 0x2c6   : > { %v1469_v62 = vpack.c.bf16 %v1434_v58, %v1433_v57  ;;  %v1321_v63 = vadd.f32 %v2770_v61, %v3331_v7  ;;  %v1312_v0 = vpop.f32.mrb[29].mxu0 }
 0x2c7   : > { %v1468_v1 = vpack.c.bf16 %v1432_v60, %v1431_v59  ;;  %v1313_v2 = vadd.f32 %v3331_v7, %v1312_v0  ;;  %v2771_v3 = vpop.f32.mrb[30].mxu0 }
 0x2c8   : > { %v1405_v49 = vmul.f32 0.2, %v1321_v63  ;;  %v1324_v4 = vadd.f32 %v2771_v3, %v3331_v7  ;;  %v1315_v5 = vpop.f32.mrb[31].mxu0 }
 0x2c9   : > { %v1403_v6 = vmul.f32 0.2, %v1313_v2  ;;  %v1316_v8 = vadd.f32 %v3331_v7, %v1315_v5  ;;  %2804 = vmatprep.mubr.msk.bf16.mxu1 %vm853_vm2, %v1468_v1 }
 0x2ca   : > { %v1406_v9 = vmul.f32 0.2, %v1324_v4  ;;  %2805 = vmatmul.mubr.msk.bf16.gmra.mrb[56].mxu1 %vm853_vm2, %v1469_v62  ;;  %v1437_v11 = vmax.f32 %v1321_v63, %v1405_v49 }
 0x2cb   : > { %v1404_v10 = vmul.f32 0.2, %v1316_v8  ;;  %v1435_v13 = vmax.f32 %v1313_v2, %v1403_v6 }
 0x2cc   : > { %v1438_v12 = vmax.f32 %v1324_v4, %v1406_v9 }
 0x2cd   : > { %v1436_v14 = vmax.f32 %v1316_v8, %v1404_v10  ;;  %v2774_v15 = vpop.f32.mrb[32].mxu0 }
 0x2ce   : > { %v1471_v16 = vpack.c.bf16 %v1438_v12, %v1437_v11  ;;  %v1337_v17 = vadd.f32 %v2774_v15, %v3331_v7  ;;  %v1328_v19 = vpop.f32.mrb[33].mxu0 }
 0x2cf   : > { %v1470_v20 = vpack.c.bf16 %v1436_v14, %v1435_v13  ;;  %v1329_v21 = vadd.f32 %v3331_v7, %v1328_v19  ;;  %v2775_v22 = vpop.f32.mrb[34].mxu0 }
 0x2d0   : > { %v1409_v23 = vmul.f32 0.2, %v1337_v17  ;;  %v1340_v25 = vadd.f32 %v2775_v22, %v3331_v7  ;;  %v1331_v27 = vpop.f32.mrb[35].mxu0 }
 0x2d1   : > { %v1407_v28 = vmul.f32 0.2, %v1329_v21  ;;  %v1332_v29 = vadd.f32 %v3331_v7, %v1331_v27  ;;  %2808 = vmatprep.mubr.msk.bf16.mxu1 %vm853_vm2, %v1470_v20 }
 0x2d2   : > { %v1410_v30 = vmul.f32 0.2, %v1340_v25  ;;  %2809 = vmatmul.mubr.msk.bf16.gmra.mrb[60].mxu1 %vm853_vm2, %v1471_v16  ;;  %v1441_v32 = vmax.f32 %v1337_v17, %v1409_v23 }
 0x2d3   : > { %v1408_v31 = vmul.f32 0.2, %v1332_v29  ;;  %v1439_v34 = vmax.f32 %v1329_v21, %v1407_v28 }
 0x2d4   : > { %v1442_v33 = vmax.f32 %v1340_v25, %v1410_v30 }
 0x2d5   : > { %v1440_v35 = vmax.f32 %v1332_v29, %v1408_v31  ;;  %v2778_v36 = vpop.f32.mrb[36].mxu0 }
 0x2d6   : > { %v1473_v37 = vpack.c.bf16 %v1442_v33, %v1441_v32  ;;  %v1353_v38 = vadd.f32 %v2778_v36, %v3331_v7  ;;  %v1344_v39 = vpop.f32.mrb[37].mxu0 }
 0x2d7   : > { %v1472_v40 = vpack.c.bf16 %v1440_v35, %v1439_v34  ;;  %v1345_v41 = vadd.f32 %v3331_v7, %v1344_v39  ;;  %v2779_v42 = vpop.f32.mrb[38].mxu0 }
 0x2d8   : > { %v1413_v43 = vmul.f32 0.2, %v1353_v38  ;;  %v1356_v44 = vadd.f32 %v2779_v42, %v3331_v7  ;;  %v1347_v45 = vpop.f32.mrb[39].mxu0 }
 0x2d9   : > { %v1411_v46 = vmul.f32 0.2, %v1345_v41  ;;  %v1348_v26 = vadd.f32 %v3331_v7, %v1347_v45  ;;  %2812 = vmatprep.mubr.msk.bf16.mxu1 %vm853_vm2, %v1472_v40 }
 0x2da   : > { %v1414_v18 = vmul.f32 0.2, %v1356_v44  ;;  %2813 = vmatmul.mubr.msk.bf16.gmra.mrb[64].mxu1 %vm853_vm2, %v1473_v37  ;;  %v1445_v47 = vmax.f32 %v1353_v38, %v1413_v43 }
 0x2db   : > { %v1412_v24 = vmul.f32 0.2, %v1348_v26  ;;  %v1443_v50 = vmax.f32 %v1345_v41, %v1411_v46 }
 0x2dc   : > { %v1446_v48 = vmax.f32 %v1356_v44, %v1414_v18 }
 0x2dd   : > { %v1444_v51 = vmax.f32 %v1348_v26, %v1412_v24  ;;  %v2782_v52 = vpop.f32.mrb[40].mxu0 }
 0x2de   : > { %v1475_v53 = vpack.c.bf16 %v1446_v48, %v1445_v47  ;;  %v1369_v54 = vadd.f32 %v2782_v52, %v3331_v7  ;;  %v1360_v55 = vpop.f32.mrb[41].mxu0 }
 0x2df   : > { %v1474_v56 = vpack.c.bf16 %v1444_v51, %v1443_v50  ;;  %v1361_v57 = vadd.f32 %v3331_v7, %v1360_v55  ;;  %v2783_v58 = vpop.f32.mrb[42].mxu0 }
 0x2e0   : > { %v1417_v59 = vmul.f32 0.2, %v1369_v54  ;;  %v1372_v60 = vadd.f32 %v2783_v58, %v3331_v7  ;;  %v1363_v61 = vpop.f32.mrb[43].mxu0 }
 0x2e1   : > { %v1415_v62 = vmul.f32 0.2, %v1361_v57  ;;  %v1364_v63 = vadd.f32 %v3331_v7, %v1363_v61  ;;  %2816 = vmatprep.mubr.msk.bf16.mxu1 %vm853_vm2, %v1474_v56 }
 0x2e2   : > { %v1418_v0 = vmul.f32 0.2, %v1372_v60  ;;  %2817 = vmatmul.mubr.msk.bf16.gmra.mrb[68].mxu1 %vm853_vm2, %v1475_v53  ;;  %v1449_v2 = vmax.f32 %v1369_v54, %v1417_v59 }
 0x2e3   : > { %v1416_v1 = vmul.f32 0.2, %v1364_v63  ;;  %v1447_v49 = vmax.f32 %v1361_v57, %v1415_v62 }
 0x2e4   : > { %v1450_v3 = vmax.f32 %v1372_v60, %v1418_v0 }
 0x2e5   : > { %v1448_v4 = vmax.f32 %v1364_v63, %v1416_v1  ;;  %v2786_v5 = vpop.f32.mrb[44].mxu0 }
 0x2e6   : > { %v1477_v6 = vpack.c.bf16 %v1450_v3, %v1449_v2  ;;  %v1385_v8 = vadd.f32 %v2786_v5, %v3331_v7  ;;  %v1376_v9 = vpop.f32.mrb[45].mxu0 }
 0x2e7   : > { %v1476_v10 = vpack.c.bf16 %v1448_v4, %v1447_v49  ;;  %v1377_v11 = vadd.f32 %v3331_v7, %v1376_v9  ;;  %v2787_v12 = vpop.f32.mrb[46].mxu0 }
 0x2e8   : > { %v1421_v13 = vmul.f32 0.2, %v1385_v8  ;;  %v1388_v14 = vadd.f32 %v2787_v12, %v3331_v7  ;;  %v1379_v15 = vpop.f32.mrb[47].mxu0 }
 0x2e9   : > { %v1419_v16 = vmul.f32 0.2, %v1377_v11  ;;  %v1380_v17 = vadd.f32 %v3331_v7, %v1379_v15  ;;  %2820 = vmatprep.mubr.msk.bf16.mxu1 %vm853_vm2, %v1476_v10  ;;  %v3384_v7 = vld [vmem:[%s3552_s8] ss:$0 sm:$0xff] }
 0x2ea   : > { %v1422_v19 = vmul.f32 0.2, %v1388_v14  ;;  %2821 = vmatmul.mubr.msk.bf16.gmra.mrb[72].mxu1 %vm853_vm2, %v1477_v6  ;;  %v1453_v21 = vmax.f32 %v1385_v8, %v1421_v13 }
 0x2eb   : > { %v1420_v20 = vmul.f32 0.2, %v1380_v17  ;;  %v1451_v23 = vmax.f32 %v1377_v11, %v1419_v16 }
 0x2ec   : > { %v1454_v22 = vmax.f32 %v1388_v14, %v1422_v19 }
 0x2ed   : > { %v1452_v25 = vmax.f32 %v1380_v17, %v1420_v20 }
 0x2ee   : > { %v1479_v27 = vpack.c.bf16 %v1454_v22, %v1453_v21 }
 0x2ef   : > { %v1478_v28 = vpack.c.bf16 %v1452_v25, %v1451_v23 }
 0x2f1   : > { %2824 = vmatprep.mubr.msk.bf16.mxu1 %vm853_vm2, %v1478_v28 }
 0x2f2   : > { %2825 = vmatmul.mubr.msk.bf16.gmra.mrb[76].mxu1 %vm853_vm2, %v1479_v27 }
 0x38d   : > { %v2798_v29 = vpop.f32.mrb[48].mxu1 }
 0x38e   : > { %v1601_v30 = vadd.f32 %v2798_v29, %v3384_v7  ;;  %v1592_v31 = vpop.f32.mrb[49].mxu1 }
 0x38f   : > { %v1593_v32 = vadd.f32 %v3384_v7, %v1592_v31  ;;  %v2799_v33 = vpop.f32.mrb[50].mxu1 }
 0x390   : > { %v1721_v34 = vmul.f32 0.2, %v1601_v30  ;;  %v1604_v35 = vadd.f32 %v2799_v33, %v3384_v7  ;;  %v1595_v36 = vpop.f32.mrb[51].mxu1 }
 0x391   : > { %v1719_v37 = vmul.f32 0.2, %v1593_v32  ;;  %v1596_v38 = vadd.f32 %v3384_v7, %v1595_v36 }
 0x392   : > { %v1722_v39 = vmul.f32 0.2, %v1604_v35  ;;  %v1753_v41 = vmax.f32 %v1601_v30, %v1721_v34 }
 0x393   : > { %v1720_v40 = vmul.f32 0.2, %v1596_v38  ;;  %v1751_v43 = vmax.f32 %v1593_v32, %v1719_v37 }
 0x394   : > { %v1754_v42 = vmax.f32 %v1604_v35, %v1722_v39 }
 0x395   : > { %v1752_v44 = vmax.f32 %v1596_v38, %v1720_v40  ;;  %v2802_v45 = vpop.f32.mrb[52].mxu1 }
 0x396   : > { %v1793_v46 = vpack.c.bf16 %v1754_v42, %v1753_v41  ;;  %v1617_v26 = vadd.f32 %v2802_v45, %v3384_v7  ;;  %v1608_v18 = vpop.f32.mrb[53].mxu1 }
 0x397   : > { %v1792_v24 = vpack.c.bf16 %v1752_v44, %v1751_v43  ;;  %v1609_v47 = vadd.f32 %v3384_v7, %v1608_v18  ;;  %v2803_v48 = vpop.f32.mrb[54].mxu1 }
 0x398   : > { %v1725_v50 = vmul.f32 0.2, %v1617_v26  ;;  %v1620_v51 = vadd.f32 %v2803_v48, %v3384_v7  ;;  %v1611_v52 = vpop.f32.mrb[55].mxu1 }
 0x399   : > { %v1723_v53 = vmul.f32 0.2, %v1609_v47  ;;  %v1612_v54 = vadd.f32 %v3384_v7, %v1611_v52  ;;  %2836 = vmatprep.mubr.msk.bf16.mxu0 %vm853_vm2, %v1792_v24 }
 0x39a   : > { %v1726_v55 = vmul.f32 0.2, %v1620_v51  ;;  %2837 = vmatmul.mubr.msk.bf16.vlgmr.msra.gmra.mrb[48].mxu0 %vm853_vm2, %v1793_v46  ;;  %v1757_v57 = vmax.f32 %v1617_v26, %v1725_v50 }
 0x39b   : > { %v1724_v56 = vmul.f32 0.2, %v1612_v54  ;;  %v1755_v59 = vmax.f32 %v1609_v47, %v1723_v53 }
 0x39c   : > { %v1758_v58 = vmax.f32 %v1620_v51, %v1726_v55 }
 0x39d   : > { %v1756_v60 = vmax.f32 %v1612_v54, %v1724_v56  ;;  %v2806_v61 = vpop.f32.mrb[56].mxu1 }
 0x39e   : > { %v1795_v62 = vpack.c.bf16 %v1758_v58, %v1757_v57  ;;  %v1633_v63 = vadd.f32 %v2806_v61, %v3384_v7  ;;  %v1624_v0 = vpop.f32.mrb[57].mxu1 }
 0x39f   : > { %v1794_v1 = vpack.c.bf16 %v1756_v60, %v1755_v59  ;;  %v1625_v2 = vadd.f32 %v3384_v7, %v1624_v0  ;;  %v2807_v3 = vpop.f32.mrb[58].mxu1 }
 0x3a0   : > { %v1729_v49 = vmul.f32 0.2, %v1633_v63  ;;  %v1636_v4 = vadd.f32 %v2807_v3, %v3384_v7  ;;  %v1627_v5 = vpop.f32.mrb[59].mxu1 }
 0x3a1   : > { %v1727_v6 = vmul.f32 0.2, %v1625_v2  ;;  %v1628_v8 = vadd.f32 %v3384_v7, %v1627_v5  ;;  %2840 = vmatprep.mubr.msk.bf16.mxu0 %vm853_vm2, %v1794_v1 }
 0x3a2   : > { %v1730_v9 = vmul.f32 0.2, %v1636_v4  ;;  %2841 = vmatmul.mubr.msk.bf16.gmra.mrb[52].mxu0 %vm853_vm2, %v1795_v62  ;;  %v1761_v11 = vmax.f32 %v1633_v63, %v1729_v49 }
 0x3a3   : > { %v1728_v10 = vmul.f32 0.2, %v1628_v8  ;;  %v1759_v13 = vmax.f32 %v1625_v2, %v1727_v6 }
 0x3a4   : > { %v1762_v12 = vmax.f32 %v1636_v4, %v1730_v9 }
 0x3a5   : > { %v1760_v14 = vmax.f32 %v1628_v8, %v1728_v10  ;;  %v2810_v15 = vpop.f32.mrb[60].mxu1 }
 0x3a6   : > { %v1797_v16 = vpack.c.bf16 %v1762_v12, %v1761_v11  ;;  %v1649_v17 = vadd.f32 %v2810_v15, %v3384_v7  ;;  %v1640_v19 = vpop.f32.mrb[61].mxu1 }
 0x3a7   : > { %v1796_v20 = vpack.c.bf16 %v1760_v14, %v1759_v13  ;;  %v1641_v21 = vadd.f32 %v3384_v7, %v1640_v19  ;;  %v2811_v22 = vpop.f32.mrb[62].mxu1 }
 0x3a8   : > { %v1733_v23 = vmul.f32 0.2, %v1649_v17  ;;  %v1652_v25 = vadd.f32 %v2811_v22, %v3384_v7  ;;  %v1643_v27 = vpop.f32.mrb[63].mxu1 }
 0x3a9   : > { %v1731_v28 = vmul.f32 0.2, %v1641_v21  ;;  %v1644_v29 = vadd.f32 %v3384_v7, %v1643_v27  ;;  %2844 = vmatprep.mubr.msk.bf16.mxu0 %vm853_vm2, %v1796_v20 }
 0x3aa   : > { %v1734_v30 = vmul.f32 0.2, %v1652_v25  ;;  %2845 = vmatmul.mubr.msk.bf16.gmra.mrb[56].mxu0 %vm853_vm2, %v1797_v16  ;;  %v1765_v32 = vmax.f32 %v1649_v17, %v1733_v23 }
 0x3ab   : > { %v1732_v31 = vmul.f32 0.2, %v1644_v29  ;;  %v1763_v34 = vmax.f32 %v1641_v21, %v1731_v28 }
 0x3ac   : > { %v1766_v33 = vmax.f32 %v1652_v25, %v1734_v30 }
 0x3ad   : > { %v1764_v35 = vmax.f32 %v1644_v29, %v1732_v31  ;;  %v2814_v36 = vpop.f32.mrb[64].mxu1 }
 0x3ae   : > { %v1799_v37 = vpack.c.bf16 %v1766_v33, %v1765_v32  ;;  %v1665_v38 = vadd.f32 %v2814_v36, %v3384_v7  ;;  %v1656_v39 = vpop.f32.mrb[65].mxu1 }
 0x3af   : > { %v1798_v40 = vpack.c.bf16 %v1764_v35, %v1763_v34  ;;  %v1657_v41 = vadd.f32 %v3384_v7, %v1656_v39  ;;  %v2815_v42 = vpop.f32.mrb[66].mxu1 }
 0x3b0   : > { %v1737_v43 = vmul.f32 0.2, %v1665_v38  ;;  %v1668_v44 = vadd.f32 %v2815_v42, %v3384_v7  ;;  %v1659_v45 = vpop.f32.mrb[67].mxu1 }
 0x3b1   : > { %v1735_v46 = vmul.f32 0.2, %v1657_v41  ;;  %v1660_v26 = vadd.f32 %v3384_v7, %v1659_v45  ;;  %2848 = vmatprep.mubr.msk.bf16.mxu0 %vm853_vm2, %v1798_v40 }
 0x3b2   : > { %v1738_v18 = vmul.f32 0.2, %v1668_v44  ;;  %2849 = vmatmul.mubr.msk.bf16.gmra.mrb[60].mxu0 %vm853_vm2, %v1799_v37  ;;  %v1769_v47 = vmax.f32 %v1665_v38, %v1737_v43 }
 0x3b3   : > { %v1736_v24 = vmul.f32 0.2, %v1660_v26  ;;  %v1767_v50 = vmax.f32 %v1657_v41, %v1735_v46 }
 0x3b4   : > { %v1770_v48 = vmax.f32 %v1668_v44, %v1738_v18 }
 0x3b5   : > { %v1768_v51 = vmax.f32 %v1660_v26, %v1736_v24  ;;  %v2818_v52 = vpop.f32.mrb[68].mxu1 }
 0x3b6   : > { %v1801_v53 = vpack.c.bf16 %v1770_v48, %v1769_v47  ;;  %v1681_v54 = vadd.f32 %v2818_v52, %v3384_v7  ;;  %v1672_v55 = vpop.f32.mrb[69].mxu1 }
 0x3b7   : > { %v1800_v56 = vpack.c.bf16 %v1768_v51, %v1767_v50  ;;  %v1673_v57 = vadd.f32 %v3384_v7, %v1672_v55  ;;  %v2819_v58 = vpop.f32.mrb[70].mxu1 }
 0x3b8   : > { %v1741_v59 = vmul.f32 0.2, %v1681_v54  ;;  %v1684_v60 = vadd.f32 %v2819_v58, %v3384_v7  ;;  %v1675_v61 = vpop.f32.mrb[71].mxu1 }
 0x3b9   : > { %v1739_v62 = vmul.f32 0.2, %v1673_v57  ;;  %v1676_v63 = vadd.f32 %v3384_v7, %v1675_v61  ;;  %2852 = vmatprep.mubr.msk.bf16.mxu0 %vm853_vm2, %v1800_v56 }
 0x3ba   : > { %v1742_v0 = vmul.f32 0.2, %v1684_v60  ;;  %2853 = vmatmul.mubr.msk.bf16.gmra.mrb[64].mxu0 %vm853_vm2, %v1801_v53  ;;  %v1773_v2 = vmax.f32 %v1681_v54, %v1741_v59 }
 0x3bb   : > { %v1740_v1 = vmul.f32 0.2, %v1676_v63  ;;  %v1771_v49 = vmax.f32 %v1673_v57, %v1739_v62 }
 0x3bc   : > { %v1774_v3 = vmax.f32 %v1684_v60, %v1742_v0 }
 0x3bd   : > { %v1772_v4 = vmax.f32 %v1676_v63, %v1740_v1  ;;  %v2822_v5 = vpop.f32.mrb[72].mxu1 }
 0x3be   : > { %v1803_v6 = vpack.c.bf16 %v1774_v3, %v1773_v2  ;;  %v1697_v8 = vadd.f32 %v2822_v5, %v3384_v7  ;;  %v1688_v9 = vpop.f32.mrb[73].mxu1 }
 0x3bf   : > { %v1802_v10 = vpack.c.bf16 %v1772_v4, %v1771_v49  ;;  %v1689_v11 = vadd.f32 %v3384_v7, %v1688_v9  ;;  %v2823_v12 = vpop.f32.mrb[74].mxu1 }
 0x3c0   : > { %v1745_v13 = vmul.f32 0.2, %v1697_v8  ;;  %v1700_v14 = vadd.f32 %v2823_v12, %v3384_v7  ;;  %v1691_v15 = vpop.f32.mrb[75].mxu1 }
 0x3c1   : > { %v1743_v16 = vmul.f32 0.2, %v1689_v11  ;;  %v1692_v17 = vadd.f32 %v3384_v7, %v1691_v15  ;;  %2856 = vmatprep.mubr.msk.bf16.mxu0 %vm853_vm2, %v1802_v10 }
 0x3c2   : > { %v1746_v19 = vmul.f32 0.2, %v1700_v14  ;;  %2857 = vmatmul.mubr.msk.bf16.gmra.mrb[68].mxu0 %vm853_vm2, %v1803_v6  ;;  %v1777_v21 = vmax.f32 %v1697_v8, %v1745_v13 }
 0x3c3   : > { %v1744_v20 = vmul.f32 0.2, %v1692_v17  ;;  %v1775_v23 = vmax.f32 %v1689_v11, %v1743_v16 }
 0x3c4   : > { %v1778_v22 = vmax.f32 %v1700_v14, %v1746_v19 }
 0x3c5   : > { %v1776_v25 = vmax.f32 %v1692_v17, %v1744_v20  ;;  %v2826_v27 = vpop.f32.mrb[76].mxu1 }
 0x3c6   : > { %v1805_v28 = vpack.c.bf16 %v1778_v22, %v1777_v21  ;;  %v1713_v29 = vadd.f32 %v2826_v27, %v3384_v7  ;;  %v1704_v30 = vpop.f32.mrb[77].mxu1 }
 0x3c7   : > { %v1804_v31 = vpack.c.bf16 %v1776_v25, %v1775_v23  ;;  %v1705_v32 = vadd.f32 %v3384_v7, %v1704_v30  ;;  %v2827_v33 = vpop.f32.mrb[78].mxu1 }
 0x3c8   : > { %v1749_v34 = vmul.f32 0.2, %v1713_v29  ;;  %v1716_v35 = vadd.f32 %v2827_v33, %v3384_v7  ;;  %v1707_v36 = vpop.f32.mrb[79].mxu1 }
 0x3c9   : > { %v1747_v37 = vmul.f32 0.2, %v1705_v32  ;;  %v1708_v38 = vadd.f32 %v3384_v7, %v1707_v36  ;;  %2860 = vmatprep.mubr.msk.bf16.mxu0 %vm853_vm2, %v1804_v31  ;;  %v3438_v7 = vld [vmem:[%s3554_s10] ss:$0 sm:$0xff] }
 0x3ca   : > { %v1750_v39 = vmul.f32 0.2, %v1716_v35  ;;  %2861 = vmatmul.mubr.msk.bf16.gmra.mrb[72].mxu0 %vm853_vm2, %v1805_v28  ;;  %v1781_v41 = vmax.f32 %v1713_v29, %v1749_v34 }
 0x3cb   : > { %v1748_v40 = vmul.f32 0.2, %v1708_v38  ;;  %v1779_v43 = vmax.f32 %v1705_v32, %v1747_v37 }
 0x3cc   : > { %v1782_v42 = vmax.f32 %v1716_v35, %v1750_v39 }
 0x3cd   : > { %v1780_v44 = vmax.f32 %v1708_v38, %v1748_v40 }
 0x3ce   : > { %v1807_v45 = vpack.c.bf16 %v1782_v42, %v1781_v41 }
 0x3cf   : > { %v1806_v46 = vpack.c.bf16 %v1780_v44, %v1779_v43 }
 0x3d1   : > { %2864 = vmatprep.mubr.msk.bf16.mxu0 %vm853_vm2, %v1806_v46 }
 0x3d2   : > { %2865 = vmatmul.mubr.msk.bf16.gmra.mrb[76].mxu0 %vm853_vm2, %v1807_v45 }
 0x46d   : > { %v2838_v26 = vpop.f32.mrb[48].mxu0 }
 0x46e   : > { %v1920_v18 = vpop.f32.mrb[49].mxu0  ;;  %v1929_v47 = vadd.f32 %v2838_v26, %v3438_v7 }
 0x46f   : > { %v2839_v24 = vpop.f32.mrb[50].mxu0  ;;  %v1921_v51 = vadd.f32 %v3438_v7, %v1920_v18 }
 0x470   : > { %v1932_v48 = vadd.f32 %v2839_v24, %v3438_v7  ;;  %v1923_v50 = vpop.f32.mrb[51].mxu0 }
 0x471   : > { %v1924_v52 = vadd.f32 %v3438_v7, %v1923_v50 }
 0x472   : > { %v2487_v53 = vpack.c.bf16 %v1932_v48, %v1929_v47 }
 0x473   : > { %v2482_v54 = vpack.c.bf16 %v1924_v52, %v1921_v51 }
 0x474   : > { %2559 = vst [vmem:[%s3446_s13 + $0x8] sm:$0xff] %v2487_v53  }
 0x475   : > { %2483 = vst [vmem:[%s3446_s13] sm:$0xff] %v2482_v54   ;;  %v2842_v55 = vpop.f32.mrb[52].mxu0 }
 0x476   : > { %v1936_v56 = vpop.f32.mrb[53].mxu0  ;;  %v1945_v58 = vadd.f32 %v2842_v55, %v3438_v7 }
 0x477   : > { %v2843_v57 = vpop.f32.mrb[54].mxu0  ;;  %v1937_v61 = vadd.f32 %v3438_v7, %v1936_v56 }
 0x478   : > { %v1948_v59 = vadd.f32 %v2843_v57, %v3438_v7  ;;  %v1939_v60 = vpop.f32.mrb[55].mxu0 }
 0x479   : > { %v1940_v62 = vadd.f32 %v3438_v7, %v1939_v60 }
 0x47a   : > { %v2497_v63 = vpack.c.bf16 %v1948_v59, %v1945_v58 }
 0x47b   : > { %v2492_v0 = vpack.c.bf16 %v1940_v62, %v1937_v61 }
 0x47c   : > { %2561 = vst [vmem:[%s3446_s13 + $0x18] sm:$0xff] %v2497_v63  }
 0x47d   : > { %2560 = vst [vmem:[%s3446_s13 + $0x10] sm:$0xff] %v2492_v0   ;;  %v2846_v1 = vpop.f32.mrb[56].mxu0 }
 0x47e   : > { %v1952_v2 = vpop.f32.mrb[57].mxu0  ;;  %v1961_v49 = vadd.f32 %v2846_v1, %v3438_v7 }
 0x47f   : > { %v2847_v3 = vpop.f32.mrb[58].mxu0  ;;  %v1953_v6 = vadd.f32 %v3438_v7, %v1952_v2 }
 0x480   : > { %v1964_v4 = vadd.f32 %v2847_v3, %v3438_v7  ;;  %v1955_v5 = vpop.f32.mrb[59].mxu0 }
 0x481   : > { %v1956_v8 = vadd.f32 %v3438_v7, %v1955_v5 }
 0x482   : > { %v2507_v9 = vpack.c.bf16 %v1964_v4, %v1961_v49 }
 0x483   : > { %v2502_v10 = vpack.c.bf16 %v1956_v8, %v1953_v6 }
 0x484   : > { %2563 = vst [vmem:[%s3446_s13 + $0x28] sm:$0xff] %v2507_v9  }
 0x485   : > { %2562 = vst [vmem:[%s3446_s13 + $0x20] sm:$0xff] %v2502_v10   ;;  %v2850_v11 = vpop.f32.mrb[60].mxu0 }
 0x486   : > { %v1968_v12 = vpop.f32.mrb[61].mxu0  ;;  %v1977_v14 = vadd.f32 %v2850_v11, %v3438_v7 }
 0x487   : > { %v2851_v13 = vpop.f32.mrb[62].mxu0  ;;  %v1969_v17 = vadd.f32 %v3438_v7, %v1968_v12 }
 0x488   : > { %v1980_v15 = vadd.f32 %v2851_v13, %v3438_v7  ;;  %v1971_v16 = vpop.f32.mrb[63].mxu0 }
 0x489   : > { %v1972_v19 = vadd.f32 %v3438_v7, %v1971_v16 }
 0x48a   : > { %v2517_v20 = vpack.c.bf16 %v1980_v15, %v1977_v14 }
 0x48b   : > { %v2512_v21 = vpack.c.bf16 %v1972_v19, %v1969_v17 }
 0x48c   : > { %2565 = vst [vmem:[%s3446_s13 + $0x38] sm:$0xff] %v2517_v20  }
 0x48d   : > { %2564 = vst [vmem:[%s3446_s13 + $0x30] sm:$0xff] %v2512_v21   ;;  %v2854_v22 = vpop.f32.mrb[64].mxu0 }
 0x48e   : > { %v1984_v23 = vpop.f32.mrb[65].mxu0  ;;  %v1993_v27 = vadd.f32 %v2854_v22, %v3438_v7 }
 0x48f   : > { %v2855_v25 = vpop.f32.mrb[66].mxu0  ;;  %v1985_v30 = vadd.f32 %v3438_v7, %v1984_v23 }
 0x490   : > { %v1996_v28 = vadd.f32 %v2855_v25, %v3438_v7  ;;  %v1987_v29 = vpop.f32.mrb[67].mxu0 }
 0x491   : > { %v1988_v31 = vadd.f32 %v3438_v7, %v1987_v29 }
 0x492   : > { %v2527_v32 = vpack.c.bf16 %v1996_v28, %v1993_v27 }
 0x493   : > { %v2522_v33 = vpack.c.bf16 %v1988_v31, %v1985_v30 }
 0x494   : > { %2567 = vst [vmem:[%s3446_s13 + $0x48] sm:$0xff] %v2527_v32  }
 0x495   : > { %2566 = vst [vmem:[%s3446_s13 + $0x40] sm:$0xff] %v2522_v33   ;;  %v2858_v34 = vpop.f32.mrb[68].mxu0 }
 0x496   : > { %v2000_v35 = vpop.f32.mrb[69].mxu0  ;;  %v2009_v37 = vadd.f32 %v2858_v34, %v3438_v7 }
 0x497   : > { %v2859_v36 = vpop.f32.mrb[70].mxu0  ;;  %v2001_v40 = vadd.f32 %v3438_v7, %v2000_v35 }
 0x498   : > { %v2012_v38 = vadd.f32 %v2859_v36, %v3438_v7  ;;  %v2003_v39 = vpop.f32.mrb[71].mxu0 }
 0x499   : > { %v2004_v41 = vadd.f32 %v3438_v7, %v2003_v39 }
 0x49a   : > { %v2537_v42 = vpack.c.bf16 %v2012_v38, %v2009_v37 }
 0x49b   : > { %v2532_v43 = vpack.c.bf16 %v2004_v41, %v2001_v40 }
 0x49c   : > { %2569 = vst [vmem:[%s3446_s13 + $0x58] sm:$0xff] %v2537_v42  }
 0x49d   : > { %2568 = vst [vmem:[%s3446_s13 + $0x50] sm:$0xff] %v2532_v43   ;;  %v2862_v44 = vpop.f32.mrb[72].mxu0 }
 0x49e   : > { %v2016_v45 = vpop.f32.mrb[73].mxu0  ;;  %v2025_v26 = vadd.f32 %v2862_v44, %v3438_v7 }
 0x49f   : > { %v2863_v46 = vpop.f32.mrb[74].mxu0  ;;  %v2017_v47 = vadd.f32 %v3438_v7, %v2016_v45 }
 0x4a0   : > { %v2028_v18 = vadd.f32 %v2863_v46, %v3438_v7  ;;  %v2019_v24 = vpop.f32.mrb[75].mxu0 }
 0x4a1   : > { %v2020_v48 = vadd.f32 %v3438_v7, %v2019_v24 }
 0x4a2   : > { %v2547_v50 = vpack.c.bf16 %v2028_v18, %v2025_v26 }
 0x4a3   : > { %v2542_v51 = vpack.c.bf16 %v2020_v48, %v2017_v47 }
 0x4a4   : > { %2571 = vst [vmem:[%s3446_s13 + $0x68] sm:$0xff] %v2547_v50  }
 0x4a5   : > { %2570 = vst [vmem:[%s3446_s13 + $0x60] sm:$0xff] %v2542_v51   ;;  %v2866_v52 = vpop.f32.mrb[76].mxu0 }
 0x4a6   : > { %v2032_v53 = vpop.f32.mrb[77].mxu0  ;;  %v2041_v55 = vadd.f32 %v2866_v52, %v3438_v7 }
 0x4a7   : > { %v2867_v54 = vpop.f32.mrb[78].mxu0  ;;  %v2033_v58 = vadd.f32 %v3438_v7, %v2032_v53 }
 0x4a8   : > { %v2044_v56 = vadd.f32 %v2867_v54, %v3438_v7  ;;  %v2035_v57 = vpop.f32.mrb[79].mxu0 }
 0x4a9   : > { %v2036_v59 = vadd.f32 %v3438_v7, %v2035_v57 }
 0x4aa   : > { %v2557_v60 = vpack.c.bf16 %v2044_v56, %v2041_v55 }
 0x4ab   : > { %v2552_v61 = vpack.c.bf16 %v2036_v59, %v2033_v58 }
 0x4ac   : > { %2573 = vst [vmem:[%s3446_s13 + $0x78] sm:$0xff] %v2557_v60  }
 0x4ad   : > { %2572 = vst [vmem:[%s3446_s13 + $0x70] sm:$0xff] %v2552_v61  }
 0x4ae   : > { %2962 = shalt.err (!%p2959_p3)
}
 0x4af   : > { %s2963_s25 = scalar_lea.hbm %s3495_s24, 2048  ;;  %s2967_s22 = scalar_lea.hbm %s3555_s11, 4096 }
 0x4b0   : > { %p2964_p4 = scmp.ne.s32.totalorder %s3495_s24, %s2963_s25  ;;  %p2968_p9 = scmp.lt.u32.totalorder %s3495_s24, %s3555_s11 }
 0x4b1   : > { %p2969_p10 = scmp.lt.u32.totalorder %s2967_s22, %s2963_s25  ;;  %p2971_p12 = scmp.lt.u32.totalorder %s2963_s25, %s3495_s24 }
 0x4b2   : > { %p2965_p7 = pnand %p2964_p4, %p3114_p5 }
 0x4b3   : > { %p2970_p11 = por %p2969_p10, %p2968_p9 }
 0x4b4   : > { %p2966_p8 = pneg %p2965_p7 }
 0x4b5   : > { %p2972_p13 = por %p2971_p12, %p2970_p11 }
 0x4b7   : > { %p2973_p0 = pnand %p2972_p13, %p2966_p8 }
 0x4b9   : > { %2976 = shalt.err (!%p2973_p0)
}
 0x4ba   : > { %s3014_s30 = smov 64   ;;  %s3015_s14 = smov 4  }
 0x4bb   : > { %2874 = dma.vmem_to_hbm [thread:$0]  (%p3114_p5), %s3497_s15, 2048, %s3495_s24, %s3503_s21, %s3014_s30, %s3014_s30, %s3015_s14  }
 0x4bc PF: > { %p2880_p1 = scmp.ge.s32.totalorder %s3011_s20, 2  ;;  %s2236_s13 = sand.u32 1, %s2999_s17  }
 0x4bd   : > { %s2237_s25 = scalar_lea.sflag [#allocation3], %s2236_s13 }
 0x4be   : > { %p2877_p2 = pnand %p2880_p1, %p3118_p6 }
 0x4c0   : > { %2994 = dma.done.wait (!%p2877_p2), %s2237_s25, 2048  }
 0x4c1   : > { %2996 = vsyncadd (!%p2877_p2), %s2237_s25, 4294965248  ;;  %p21_p3 = scmp.ge.s32.totalorder %s3101_s23, 4   ;;  %s3558_s17 = smov %s3003_s18 }
 0x4c2   : > { %s3559_s18 = smov %s3007_s19  ;;  %s3560_s19 = smov %s3112_s26 }
 0x4c3   : > { %s3561_s20 = smov %s3101_s23  ;;  %23 = sbr.rel (!%p21_p3) target bundleno = 3 (0x3), region = 99 }
 0x4ca   :  { %2242 = vsyncpa [#allocation3], 1 }
 0x4cb   :  { %2244 = vsyncpa [#allocation3 + $0x1], 1 }

</bundles_post_ra>
